<compile_context>
chip_gen: v7x
topology: tpu7x:2x2x1
jax: 0.10.0
libtpu: 0.0.40
codegen_flags: <defaults>
</compile_context>

<pallas_src>
import functools

import jax
import jax.numpy as jnp
from jax import lax
from jax.experimental import pallas as pl
from jax.experimental.pallas import tpu as pltpu


def _round_up(x, m):
    return ((x + m - 1) // m) * m


def _upsample_phase_kernel(x_ref, a_ref, b_ref, o_ref, *, tile_m, wp):
    # x_ref: (1, (H+1)*Wp, 2*Cin)  zero-padded input, flattened over (row, col),
    #                              lane dim packs [x(m, n), x(m, n+1)].
    # a_ref: (2, 2*Cin, 4*Cout)    a_ref[0] = [A00; A01], a_ref[1] = [A10; A11]
    #                              (neighbour phase weights stacked along K).
    # b_ref: (1, 4*Cout)           bias tiled over the 4 phases (f32).
    # o_ref: (1, tile_m, 4*Cout)   pixel-shuffle output tile, tile_m = tile_h*Wp.
    r = pl.program_id(1)
    # Both offsets are multiples of 8 (tile_m % 8 == 0 and Wp % 8 == 0 by
    # construction) -> sublane-aligned views, no realignment copies.
    s0 = pl.multiple_of(r * tile_m, 8)
    s1 = pl.multiple_of(r * tile_m + wp, 8)

    x_top = x_ref[0, pl.ds(s0, tile_m), :]   # rows m   : [x(m,n)   | x(m,n+1)]
    x_bot = x_ref[0, pl.ds(s1, tile_m), :]   # rows m+1 : [x(m+1,n) | x(m+1,n+1)]

    # Two MXU matmuls with K = 2*Cin each, f32 accumulation.
    acc = jnp.dot(x_top, a_ref[0], preferred_element_type=jnp.float32)
    acc = acc + jnp.dot(x_bot, a_ref[1], preferred_element_type=jnp.float32)

    # Minimal f32 epilogue: bias add + downcast to the compute dtype.
    o_ref[0] = (acc + b_ref[...]).astype(o_ref.dtype)


def _pick_row_tile(h, wp, target_m, want_multi_step):
    """Smallest divisor tile_h of h with tile_h*wp >= target_m (amortize the
    ~0.35us/step overhead and fill the MXU).  When want_multi_step (N == 1),
    keep >= 2 row steps so both v7x TensorCores get work."""
    divs = [d for d in range(1, h + 1) if h % d == 0]
    if want_multi_step and h > 1:
        divs = [d for d in divs if d < h]
    for d in divs:
        if d * wp >= target_m:
            return d
    return divs[-1]


def conv_transpose2d_pallas(x_nchw, weight, bias, *, output_padding=0,
                            compute_dtype=jnp.bfloat16, target_m=512):
    """ConvTranspose2d(kernel=3, stride=2, padding=1) forward pass.
    weight: (Cin, Cout, 3, 3) (PyTorch ConvTranspose2d layout), bias: (Cout,)."""
    assert output_padding in (0, 1), "stride=2 ConvTranspose2d needs output_padding in {0,1}"
    N, Cin, H, W = x_nchw.shape
    Cout = weight.shape[1]
    Ho = 2 * H - 1 + output_padding
    Wo = 2 * W - 1 + output_padding
    out_dtype = x_nchw.dtype
    itemsize = jnp.dtype(compute_dtype).itemsize

    # Width (incl. right halo column) padded to a multiple of 8 so every kernel
    # slice start and every tile_m is sublane-aligned.
    Wp = _round_up(W + 1, 8)

    # ---- layout glue (plain JAX; fuses into one pad+concat fusion) ----------
    # TODO(synk): if this Upsample sits inside a full NHWC network, keep
    # activations NHWC end-to-end and drop the NCHW<->NHWC transposes here.
    x = jnp.transpose(x_nchw, (0, 2, 3, 1)).astype(compute_dtype)        # (N,H,W,Cin)
    xp = jnp.pad(x, ((0, 0), (0, 1), (0, Wp - W), (0, 0)))               # (N,H+1,Wp,Cin)
    # Column-neighbour (n+1) packed along lanes -> (N, H+1, Wp, 2*Cin).
    xn = jnp.pad(xp[:, :, 1:, :], ((0, 0), (0, 0), (0, 1), (0, 0)))
    xw = jnp.concatenate([xp, xn], axis=-1).reshape(N, (H + 1) * Wp, 2 * Cin)

    # Phase weights: tap (kh, kw) contributes to output parity phases as derived
    # from oh = 2*ih - 1 + kh (likewise kw).  Lane order of phases: [ee,eo,oe,oo].
    wt = weight.astype(jnp.float32)                                      # (Cin,Cout,3,3)
    z = jnp.zeros((Cin, Cout), jnp.float32)

    def phases(*ws):                                                     # -> (Cin, 4*Cout)
        return jnp.concatenate(list(ws), axis=-1)

    a00 = phases(wt[:, :, 1, 1], wt[:, :, 1, 2], wt[:, :, 2, 1], wt[:, :, 2, 2])  # x[m  ,n  ]
    a01 = phases(z,              wt[:, :, 1, 0], z,              wt[:, :, 2, 0])  # x[m  ,n+1]
    a10 = phases(z,              z,              wt[:, :, 0, 1], wt[:, :, 0, 2])  # x[m+1,n  ]
    a11 = phases(z,              z,              z,              wt[:, :, 0, 0])  # x[m+1,n+1]
    A = jnp.stack([jnp.concatenate([a00, a01], axis=0),                  # rows m
                   jnp.concatenate([a10, a11], axis=0)],                 # rows m+1
                  axis=0).astype(compute_dtype)                          # (2, 2*Cin, 4*Cout)
    b4 = jnp.tile(bias.reshape(1, Cout).astype(jnp.float32), (1, 4))     # (1, 4*Cout)

    # ---- tiling / grid -------------------------------------------------------
    tile_h = _pick_row_tile(H, Wp, target_m, want_multi_step=(N == 1))
    tile_m = tile_h * Wp
    grid = (N, H // tile_h)

    # ---- VMEM budget (worst case: everything double-buffered) ---------------
    x_bytes = (H + 1) * Wp * 2 * Cin * itemsize
    w_bytes = 2 * (2 * Cin) * (4 * Cout) * itemsize
    b_bytes = 4 * Cout * 4
    o_bytes = tile_m * 4 * Cout * itemsize
    need = 2 * (x_bytes + w_bytes + b_bytes + o_bytes) + (2 << 20)
    try:
        phys_vmem = int(pltpu.get_tpu_info().vmem_capacity_bytes)
    except Exception:
        phys_vmem = 64 << 20     # conservative (v7x has 64 MiB per TensorCore)
    vmem_limit = int(min(max(need, 16 << 20), (3 * phys_vmem) // 4))

    kernel = functools.partial(_upsample_phase_kernel, tile_m=tile_m, wp=Wp)
    out_shape = jax.ShapeDtypeStruct((N, H * Wp, 4 * Cout), compute_dtype)
    cparams = pltpu.CompilerParams(
        dimension_semantics=("parallel", "parallel"),
        vmem_limit_bytes=vmem_limit)

    def build(single_buffer_consts):
        # Weights / bias are grid-invariant: single-buffer them so the pipeline
        # does not hold two copies (saves ~16 MiB at the dim=1024 decoder stage).
        kw = dict(pipeline_mode=pl.Buffered(1)) if single_buffer_consts else {}
        # TODO(synk): on v7x with very large H*W*Cin, switch in_specs[0] to a
        # row-tiled halo block (or a manual pl.ANY + make_async_copy pipeline)
        # so the whole padded image is not resident in 64 MiB VMEM.
        in_specs = [
            pl.BlockSpec((1, (H + 1) * Wp, 2 * Cin), lambda n, r: (n, 0, 0)),
            pl.BlockSpec((2, 2 * Cin, 4 * Cout), lambda n, r: (0, 0, 0), **kw),
            pl.BlockSpec((1, 4 * Cout), lambda n, r: (0, 0), **kw),
        ]
        return pl.pallas_call(
            kernel,
            out_shape=out_shape,
            grid_spec=pltpu.PrefetchScalarGridSpec(
                num_scalar_prefetch=0,
                grid=grid,
                in_specs=in_specs,
                out_specs=pl.BlockSpec((1, tile_m, 4 * Cout), lambda n, r: (n, r, 0)),
            ),
            compiler_params=cparams,
        )

    try:
        out4 = build(single_buffer_consts=True)(xw, A, b4)
    except Exception:
        # pl.Buffered(1) not supported by this jax/libtpu combo: fall back to
        # the default double-buffered pipeline (identical semantics).
        out4 = build(single_buffer_consts=False)(xw, A, b4)

    # Depth-to-space (pixel shuffle), drop pad columns, NHWC -> NCHW, crop for
    # output_padding.  XLA fuses this into a single transpose on bf16 data.
    # Note: 4*Cout < 128 only for tiny smoke-test dims; production dims >= 128
    # keep the kernel's output stores lane-dense.
    y = out4.reshape(N, H, Wp, 2, 2, Cout)[:, :, :W]                     # (N,H,W,2,2,Cout)
    y = jnp.transpose(y, (0, 5, 1, 3, 2, 4)).reshape(N, Cout, 2 * H, 2 * W)
    return y[:, :, :Ho, :Wo].astype(out_dtype)


def conv_transpose2d_ref(x, weight, bias, *, stride=2, padding=1,
                         output_padding=0, compute_dtype=jnp.bfloat16):
    """Pure-JAX reference (lax.conv_general_dilated) with the same bf16-operand /
    f32-accumulate arithmetic so the comparison is apples-to-apples."""
    k = weight.shape[-1]
    pb = k - 1 - padding
    w_oihw = jnp.transpose(weight[:, :, ::-1, ::-1], (1, 0, 2, 3)).astype(compute_dtype)
    y = lax.conv_general_dilated(
        x.astype(compute_dtype), w_oihw, window_strides=(1, 1),
        padding=[(pb, pb + output_padding), (pb, pb + output_padding)],
        lhs_dilation=(stride, stride),
        dimension_numbers=("NCHW", "OIHW", "NCHW"),
        preferred_element_type=jnp.float32)
    return (y + bias.reshape(1, -1, 1, 1).astype(jnp.float32)).astype(x.dtype)


class UpsamplePallas:
    """JAX/Pallas re-implementation of models/mambavision.py::Upsample (forward)."""
    # TODO(synk): only the Upsample ConvTranspose2d hot path is kernelized; the other
    # DeMambaVision blocks (Attention, MambaVisionMixer, Mlp, ConvBlock) are separate
    # modules left to XLA / future kernels.

    def __init__(self, dim, keep_dim=False, key=None, compute_dtype=jnp.bfloat16):
        if key is None:
            key = jax.random.PRNGKey(0)
        dim_out = dim if keep_dim else dim // 2
        k1, k2, k3, k4 = jax.random.split(key, 4)
        # PyTorch ConvTranspose2d default init: U(-b, b), b = 1/sqrt(Cout*kH*kW).
        bound = 1.0 / (dim_out * 3 * 3) ** 0.5
        self.w1 = jax.random.uniform(k1, (dim, dim_out, 3, 3), jnp.float32, -bound, bound)
        self.b1 = jax.random.uniform(k2, (dim_out,), jnp.float32, -bound, bound)
        self.w2 = jax.random.uniform(k3, (dim, dim_out, 3, 3), jnp.float32, -bound, bound)
        self.b2 = jax.random.uniform(k4, (dim_out,), jnp.float32, -bound, bound)
        self.compute_dtype = compute_dtype

    def __call__(self, x):  # x: NCHW
        if x.shape[2] == 4:
            return conv_transpose2d_pallas(x, self.w2, self.b2, output_padding=0,
                                           compute_dtype=self.compute_dtype)
        return conv_transpose2d_pallas(x, self.w1, self.b1, output_padding=1,
                                       compute_dtype=self.compute_dtype)

    def reference(self, x):
        if x.shape[2] == 4:
            return conv_transpose2d_ref(x, self.w2, self.b2, output_padding=0,
                                        compute_dtype=self.compute_dtype)
        return conv_transpose2d_ref(x, self.w1, self.b1, output_padding=1,
                                    compute_dtype=self.compute_dtype)


if __name__ == "__main__":
    key = jax.random.PRNGKey(0)
    kx1, kx2, kx3, kp1, kp2 = jax.random.split(key, 5)

    # Small demo matching the module's tiny-shape smoke test: dim=4.
    dim = 4
    mod = UpsamplePallas(dim, keep_dim=False, key=kp1)

    # Branch 1: H != 4 -> ConvTranspose2d with output_padding=1 (doubles H, W).
    x1 = jax.random.normal(kx1, (2, dim, 16, 16), jnp.float32)
    y1 = jax.block_until_ready(mod(x1))
    r1 = mod.reference(x1)
    assert y1.shape == (2, dim // 2, 32, 32), y1.shape
    assert jnp.allclose(y1, r1, rtol=1e-2, atol=1e-2), float(jnp.max(jnp.abs(y1 - r1)))

    # Branch 2: H == 4 -> ConvTranspose2d without output_padding (H,W -> 2H-1).
    x2 = jax.random.normal(kx2, (2, dim, 4, 4), jnp.float32)
    y2 = jax.block_until_ready(mod(x2))
    r2 = mod.reference(x2)
    assert y2.shape == (2, dim // 2, 7, 7), y2.shape
    assert jnp.allclose(y2, r2, rtol=1e-2, atol=1e-2), float(jnp.max(jnp.abs(y2 - r2)))

    # Larger-channel case exercising the row-tiled grid (>=2 row steps since
    # N == 1) and a lane-dense (4*Cout = 128) output block.
    dim3 = 64
    mod3 = UpsamplePallas(dim3, keep_dim=False, key=kp2)
    x3 = jax.random.normal(kx3, (1, dim3, 32, 32), jnp.float32)
    y3 = jax.block_until_ready(mod3(x3))
    r3 = mod3.reference(x3)
    assert y3.shape == (1, dim3 // 2, 64, 64), y3.shape
    assert jnp.allclose(y3, r3, rtol=1e-2, atol=1e-2), float(jnp.max(jnp.abs(y3 - r3)))

    print("KERNEL_OK")
</pallas_src>

<mosaic_0001>
module attributes {stable_mosaic.version = 11 : i64} {
  func.func @_upsample_phase_kernel(%arg0: i32, %arg1: i32, %arg2: memref<1x408x8xbf16, #tpu.memory_space<vmem>>, %arg3: memref<2x8x8xbf16, #tpu.memory_space<vmem>>, %arg4: memref<1x8xf32, #tpu.memory_space<vmem>>, %arg5: memref<1x384x8xbf16, #tpu.memory_space<vmem>>) attributes {dimension_semantics = [#tpu.dimension_semantics<parallel>, #tpu.dimension_semantics<parallel>], iteration_bounds = array<i64: 2, 1>, scalar_prefetch = 0 : i64, scratch_operands = 0 : i64, tpu.core_type = #tpu.core_type<tc>, window_params = [{transform_indices = @transform_0, window_bounds = array<i64: 1, 408, 8>}, {pipeline_mode = #tpu.pipeline_mode<synchronous>, transform_indices = @transform_1, window_bounds = array<i64: 2, 8, 8>}, {pipeline_mode = #tpu.pipeline_mode<synchronous>, transform_indices = @transform_2, window_bounds = array<i64: 1, 8>}, {transform_indices = @transform_3, window_bounds = array<i64: 1, 384, 8>}]} {
    %c384_i32 = arith.constant 384 : i32
    %0 = arith.muli %arg1, %c384_i32 : i32
    %1 = tpu.assume_multiple %0, 8 : i32
    %c384_i32_0 = arith.constant 384 : i32
    %2 = arith.muli %arg1, %c384_i32_0 : i32
    %c24_i32 = arith.constant 24 : i32
    %3 = arith.addi %2, %c24_i32 : i32
    %4 = tpu.assume_multiple %3, 8 : i32
    %c0 = arith.constant 0 : index
    %5 = arith.index_cast %1 : i32 to index
    %c0_1 = arith.constant 0 : index
    %6 = vector.load %arg2[%c0, %5, %c0_1] : memref<1x408x8xbf16, #tpu.memory_space<vmem>>, vector<1x384x8xbf16>
    %7 = vector.shape_cast %6 : vector<1x384x8xbf16> to vector<384x8xbf16>
    %c0_2 = arith.constant 0 : index
    %8 = arith.index_cast %4 : i32 to index
    %c0_3 = arith.constant 0 : index
    %9 = vector.load %arg2[%c0_2, %8, %c0_3] : memref<1x408x8xbf16, #tpu.memory_space<vmem>>, vector<1x384x8xbf16>
    %10 = vector.shape_cast %9 : vector<1x384x8xbf16> to vector<384x8xbf16>
    %c0_4 = arith.constant 0 : index
    %c0_5 = arith.constant 0 : index
    %c0_6 = arith.constant 0 : index
    %11 = vector.load %arg3[%c0_4, %c0_5, %c0_6] : memref<2x8x8xbf16, #tpu.memory_space<vmem>>, vector<1x8x8xbf16>
    %12 = vector.shape_cast %11 : vector<1x8x8xbf16> to vector<8x8xbf16>
    %cst = arith.constant dense<0.000000e+00> : vector<384x8xf32>
    %13 = tpu.matmul %7, %12, %cst {dimension_numbers = #tpu.dot_dimension_numbers<[1], [0], [0], [1], [0, 0, 1, 1], [], []>} : vector<384x8xbf16>, vector<8x8xbf16>, vector<384x8xf32> -> vector<384x8xf32>
    %c1 = arith.constant 1 : index
    %c0_7 = arith.constant 0 : index
    %c0_8 = arith.constant 0 : index
    %14 = vector.load %arg3[%c1, %c0_7, %c0_8] : memref<2x8x8xbf16, #tpu.memory_space<vmem>>, vector<1x8x8xbf16>
    %15 = vector.shape_cast %14 : vector<1x8x8xbf16> to vector<8x8xbf16>
    %cst_9 = arith.constant dense<0.000000e+00> : vector<384x8xf32>
    %16 = tpu.matmul %10, %15, %cst_9 {dimension_numbers = #tpu.dot_dimension_numbers<[1], [0], [0], [1], [0, 0, 1, 1], [], []>} : vector<384x8xbf16>, vector<8x8xbf16>, vector<384x8xf32> -> vector<384x8xf32>
    %17 = arith.addf %13, %16 : vector<384x8xf32>
    %c0_10 = arith.constant 0 : index
    %c0_11 = arith.constant 0 : index
    %18 = vector.load %arg4[%c0_10, %c0_11] : memref<1x8xf32, #tpu.memory_space<vmem>>, vector<1x8xf32>
    %19 = vector.broadcast %18 : vector<1x8xf32> to vector<384x8xf32>
    %20 = arith.addf %17, %19 : vector<384x8xf32>
    %21 = arith.truncf %20 : vector<384x8xf32> to vector<384x8xbf16>
    %c0_12 = arith.constant 0 : index
    %c0_13 = arith.constant 0 : index
    %c0_14 = arith.constant 0 : index
    %22 = vector.load %arg5[%c0_12, %c0_13, %c0_14] : memref<1x384x8xbf16, #tpu.memory_space<vmem>>, vector<1x384x8xbf16>
    %23 = vector.shape_cast %22 : vector<1x384x8xbf16> to vector<384x8xbf16>
    %24 = vector.shape_cast %21 : vector<384x8xbf16> to vector<1x384x8xbf16>
    tpu.vector_store %arg5[%c0_12, %c0_13, %c0_14], %24 {strides = array<i32>} : memref<1x384x8xbf16, #tpu.memory_space<vmem>>, vector<1x384x8xbf16>,
    return
  }
  func.func @transform_0(%arg0: i32, %arg1: i32) -> (i32, i32, i32) {
    %c0_i32 = arith.constant 0 : i32
    %c0_i32_0 = arith.constant 0 : i32
    %c0_i32_1 = arith.constant 0 : i32
    return %arg0, %c0_i32, %c0_i32_0 : i32, i32, i32
  }
  func.func @transform_1(%arg0: i32, %arg1: i32) -> (i32, i32, i32) {
    %c0_i32 = arith.constant 0 : i32
    %c0_i32_0 = arith.constant 0 : i32
    %c0_i32_1 = arith.constant 0 : i32
    %c0_i32_2 = arith.constant 0 : i32
    return %c0_i32, %c0_i32_0, %c0_i32_1 : i32, i32, i32
  }
  func.func @transform_2(%arg0: i32, %arg1: i32) -> (i32, i32) {
    %c0_i32 = arith.constant 0 : i32
    %c0_i32_0 = arith.constant 0 : i32
    %c0_i32_1 = arith.constant 0 : i32
    return %c0_i32, %c0_i32_0 : i32, i32
  }
  func.func @transform_3(%arg0: i32, %arg1: i32) -> (i32, i32, i32) {
    %c0_i32 = arith.constant 0 : i32
    %c0_i32_0 = arith.constant 0 : i32
    return %arg0, %arg1, %c0_i32 : i32, i32, i32
  }
}

module attributes {stable_mosaic.version = 11 : i64} {
  func.func @_upsample_phase_kernel(%arg0: i32, %arg1: i32, %arg2: memref<1x408x8xbf16, #tpu.memory_space<vmem>>, %arg3: memref<2x8x8xbf16, #tpu.memory_space<vmem>>, %arg4: memref<1x8xf32, #tpu.memory_space<vmem>>, %arg5: memref<1x384x8xbf16, #tpu.memory_space<vmem>>) attributes {dimension_semantics = [#tpu.dimension_semantics<parallel>, #tpu.dimension_semantics<parallel>], iteration_bounds = array<i64: 2, 1>, scalar_prefetch = 0 : i64, scratch_operands = 0 : i64, tpu.core_type = #tpu.core_type<tc>, window_params = [{transform_indices = @transform_0, window_bounds = array<i64: 1, 408, 8>}, {pipeline_mode = #tpu.pipeline_mode<synchronous>, transform_indices = @transform_1, window_bounds = array<i64: 2, 8, 8>}, {pipeline_mode = #tpu.pipeline_mode<synchronous>, transform_indices = @transform_2, window_bounds = array<i64: 1, 8>}, {transform_indices = @transform_3, window_bounds = array<i64: 1, 384, 8>}]} {
    %c384_i32 = arith.constant 384 : i32
    %0 = arith.muli %arg1, %c384_i32 : i32
    %1 = tpu.assume_multiple %0, 8 : i32
    %c384_i32_0 = arith.constant 384 : i32
    %2 = arith.muli %arg1, %c384_i32_0 : i32
    %c24_i32 = arith.constant 24 : i32
    %3 = arith.addi %2, %c24_i32 : i32
    %4 = tpu.assume_multiple %3, 8 : i32
    %c0 = arith.constant 0 : index
    %5 = arith.index_cast %1 : i32 to index
    %c0_1 = arith.constant 0 : index
    %6 = vector.load %arg2[%c0, %5, %c0_1] : memref<1x408x8xbf16, #tpu.memory_space<vmem>>, vector<1x384x8xbf16>
    %7 = vector.shape_cast %6 : vector<1x384x8xbf16> to vector<384x8xbf16>
    %c0_2 = arith.constant 0 : index
    %8 = arith.index_cast %4 : i32 to index
    %c0_3 = arith.constant 0 : index
    %9 = vector.load %arg2[%c0_2, %8, %c0_3] : memref<1x408x8xbf16, #tpu.memory_space<vmem>>, vector<1x384x8xbf16>
    %10 = vector.shape_cast %9 : vector<1x384x8xbf16> to vector<384x8xbf16>
    %c0_4 = arith.constant 0 : index
    %c0_5 = arith.constant 0 : index
    %c0_6 = arith.constant 0 : index
    %11 = vector.load %arg3[%c0_4, %c0_5, %c0_6] : memref<2x8x8xbf16, #tpu.memory_space<vmem>>, vector<1x8x8xbf16>
    %12 = vector.shape_cast %11 : vector<1x8x8xbf16> to vector<8x8xbf16>
    %cst = arith.constant dense<0.000000e+00> : vector<384x8xf32>
    %13 = tpu.matmul %7, %12, %cst {dimension_numbers = #tpu.dot_dimension_numbers<[1], [0], [0], [1], [0, 0, 1, 1], [], []>} : vector<384x8xbf16>, vector<8x8xbf16>, vector<384x8xf32> -> vector<384x8xf32>
    %c1 = arith.constant 1 : index
    %c0_7 = arith.constant 0 : index
    %c0_8 = arith.constant 0 : index
    %14 = vector.load %arg3[%c1, %c0_7, %c0_8] : memref<2x8x8xbf16, #tpu.memory_space<vmem>>, vector<1x8x8xbf16>
    %15 = vector.shape_cast %14 : vector<1x8x8xbf16> to vector<8x8xbf16>
    %cst_9 = arith.constant dense<0.000000e+00> : vector<384x8xf32>
    %16 = tpu.matmul %10, %15, %cst_9 {dimension_numbers = #tpu.dot_dimension_numbers<[1], [0], [0], [1], [0, 0, 1, 1], [], []>} : vector<384x8xbf16>, vector<8x8xbf16>, vector<384x8xf32> -> vector<384x8xf32>
    %17 = arith.addf %13, %16 : vector<384x8xf32>
    %c0_10 = arith.constant 0 : index
    %c0_11 = arith.constant 0 : index
    %18 = vector.load %arg4[%c0_10, %c0_11] : memref<1x8xf32, #tpu.memory_space<vmem>>, vector<1x8xf32>
    %19 = vector.broadcast %18 : vector<1x8xf32> to vector<384x8xf32>
    %20 = arith.addf %17, %19 : vector<384x8xf32>
    %21 = arith.truncf %20 : vector<384x8xf32> to vector<384x8xbf16>
    %c0_12 = arith.constant 0 : index
    %c0_13 = arith.constant 0 : index
    %c0_14 = arith.constant 0 : index
    %22 = vector.load %arg5[%c0_12, %c0_13, %c0_14] : memref<1x384x8xbf16, #tpu.memory_space<vmem>>, vector<1x384x8xbf16>
    %23 = vector.shape_cast %22 : vector<1x384x8xbf16> to vector<384x8xbf16>
    %24 = vector.shape_cast %21 : vector<384x8xbf16> to vector<1x384x8xbf16>
    tpu.vector_store %arg5[%c0_12, %c0_13, %c0_14], %24 {strides = array<i32>} : memref<1x384x8xbf16, #tpu.memory_space<vmem>>, vector<1x384x8xbf16>,
    return
  }
  func.func @transform_0(%arg0: i32, %arg1: i32) -> (i32, i32, i32) {
    %c0_i32 = arith.constant 0 : i32
    %c0_i32_0 = arith.constant 0 : i32
    %c0_i32_1 = arith.constant 0 : i32
    return %arg0, %c0_i32, %c0_i32_0 : i32, i32, i32
  }
  func.func @transform_1(%arg0: i32, %arg1: i32) -> (i32, i32, i32) {
    %c0_i32 = arith.constant 0 : i32
    %c0_i32_0 = arith.constant 0 : i32
    %c0_i32_1 = arith.constant 0 : i32
    %c0_i32_2 = arith.constant 0 : i32
    return %c0_i32, %c0_i32_0, %c0_i32_1 : i32, i32, i32
  }
  func.func @transform_2(%arg0: i32, %arg1: i32) -> (i32, i32) {
    %c0_i32 = arith.constant 0 : i32
    %c0_i32_0 = arith.constant 0 : i32
    %c0_i32_1 = arith.constant 0 : i32
    return %c0_i32, %c0_i32_0 : i32, i32
  }
  func.func @transform_3(%arg0: i32, %arg1: i32) -> (i32, i32, i32) {
    %c0_i32 = arith.constant 0 : i32
    %c0_i32_0 = arith.constant 0 : i32
    return %arg0, %arg1, %c0_i32 : i32, i32, i32
  }
}

</mosaic_0001>

<bundles_post_ra>
// kernel: tpu_custom_call.1
= control target key start
LH: loop header
LB: loop body
LE: loop exit
PB: predicated region body
PF: predicated region fallthrough
CT: control target
= control target key end

     0   :  { %s2096_s12 = smov 0   ;;  %s2098_s13 = smov 0   ;;  %s2388_s0 = inlined_call_operand.vmem [shape: bf16[2,408,8], index: 0, kind: input, shape index: {}]   ;;  %s2389_s1 = inlined_call_operand.vmem [shape: bf16[2,8,8], index: 1, kind: input, shape index: {}]   ;;  %s2390_s2 = inlined_call_operand.vmem [shape: f32[1,8], index: 2, kind: input, shape index: {}]   ;;  %s2391_s3 = inlined_call_operand.vmem [shape: bf16[2,384,8], index: 3, kind: output, shape index: {}]  }
   0x1   :  { %s2100_s14 = smov 0  }
   0x2 LB: > { %s25_s15 = sadd.s32 1, %s2070_s13  ;;  %p1531_p0 = scmp.ge.s32.totalorder %s2074_s14, 1  ;;  %s2074_s14 = sphi %s2100_s14, %s13_s14   ;;  %s2070_s13 = sphi %s2098_s13, %s2393_s13   ;;  %s2066_s12 = sphi %s2096_s12, %s2392_s12  }
   0x3   : > { %p27_p1 = scmp.ge.s32.totalorder %s25_s15, 2  ;;  %p151_p2 = scmp.lt.s32.totalorder %s2074_s14, 3 }
   0x5   : > { %s2395_s15 = smov (%p27_p1, %s25_s15), 0  ;;  %p152_p3 = pnand %p1531_p0, %p151_p2 }
   0x6   : > { %v1582_v0 = vld [vmem:[%s2389_s1 + $0x4] sm:$0xf] (!%p152_p3)  ;;  %vm497_vm0 = vcmask (!%p152_p3), 1043456   ;;  %v301_v1 = vld [vmem:[%s2389_s1] sm:$0xf] (!%p152_p3)  ;;  %p179_p4 = scmp.lt.s32.totalorder (!%p152_p3), %s2066_s12, 1 }
   0x7   : > { %155 = sbr.rel (%p152_p3) target bundleno = 330 (0x14a), region = 32  ;;  %1976 = vmatprep.subr.msk.bf16.mxu1 (!%p152_p3), %vm497_vm0, %v1582_v0  ;;  %1977 = vmatprep.subr.msk.bf16.mxu0 (!%p152_p3), %vm497_vm0, %v301_v1  ;;  %v499_v2 = vsel (!%p152_p3), %vm497_vm0, %v1582_v0, 0  ;;  %v919_v3 = vsel (!%p152_p3), %vm497_vm0, %v301_v1, 0  ;;  %vm424_vm1 = vcmask (!%p152_p3), 64512   ;;  %v2228_v54 = vld [vmem:[%s2390_s2] ss:$0 sm:$0xff] (!%p152_p3) }
   0x8   : > { %1829 = vmatpush3.bf16.msra.mxu1 (!%p152_p3), %v499_v2  ;;  %1879 = vmatpush3.bf16.msra.mxu0 (!%p152_p3), %v919_v3  ;;  %vm1393_vm2 = vcmask (!%p152_p3), 60416  }
   0xe   : > { %s2397_s12 = smov (!%p179_p4, %s2066_s12), 1 }
   0xf   : > { %s1978_s20 = smul.u32 204, %s2397_s12 }
  0x10   : > { %s1979_s24 = smul.u32 192, %s2397_s12 }
  0x11   : > { %s2126_s23 = scalar_lea.vmem %s2388_s0, %s1978_s20 }
  0x12   : > { %v2004_v4 = vld [vmem:[%s2126_s23 + $0xc] sm:$0xff]   ;;  %v2005_v5 = vld [vmem:[%s2126_s23] sm:$0xff]   ;;  %v2006_v6 = vld [vmem:[%s2126_s23 + $0x14] sm:$0xff]   ;;  %s2234_s29 = scalar_lea.vmem %s2391_s3, %s1979_s24 }
  0x13   : > { %1830 = vmatprep.mubr.msk.bf16.mxu1 %vm424_vm1, %v2004_v4  ;;  %1880 = vmatprep.mubr.msk.bf16.mxu0 %vm424_vm1, %v2005_v5  ;;  %v2007_v7 = vld [vmem:[%s2126_s23 + $0x8] sm:$0xff]   ;;  %v2008_v8 = vld [vmem:[%s2126_s23 + $0x1c] sm:$0xff]   ;;  %v2009_v9 = vld [vmem:[%s2126_s23 + $0x10] sm:$0xff]  }
  0x14   : > { %1831 = vmatmul.mubr.msk.bf16.vlgmr.msra.gmra.mrb[0].mxu1 %vm424_vm1, %v2006_v6  ;;  %1881 = vmatmul.mubr.msk.bf16.vlgmr.msra.gmra.mrb[0].mxu0 %vm424_vm1, %v2007_v7  ;;  %v2010_v10 = vld [vmem:[%s2126_s23 + $0x24] sm:$0xff]   ;;  %v2011_v11 = vld [vmem:[%s2126_s23 + $0x18] sm:$0xff]   ;;  %v2012_v12 = vld [vmem:[%s2126_s23 + $0x2c] sm:$0xff]  }
  0x15   : > { %1834 = vmatprep.mubr.msk.bf16.mxu1 %vm424_vm1, %v2008_v8  ;;  %1884 = vmatprep.mubr.msk.bf16.mxu0 %vm424_vm1, %v2009_v9  ;;  %v2013_v13 = vld [vmem:[%s2126_s23 + $0x20] sm:$0xff]   ;;  %v2014_v14 = vld [vmem:[%s2126_s23 + $0x34] sm:$0xff]   ;;  %v2015_v15 = vld [vmem:[%s2126_s23 + $0x28] sm:$0xff]  }
  0x16   : > { %v2016_v16 = vld [vmem:[%s2126_s23 + $0x3c] sm:$0xff]   ;;  %v2017_v17 = vld [vmem:[%s2126_s23 + $0x30] sm:$0xff]   ;;  %v2018_v18 = vld [vmem:[%s2126_s23 + $0x44] sm:$0xff]  }
  0x17   : > { %v2019_v19 = vld [vmem:[%s2126_s23 + $0x38] sm:$0xff]   ;;  %v2020_v20 = vld [vmem:[%s2126_s23 + $0x4c] sm:$0xff]   ;;  %v2021_v21 = vld [vmem:[%s2126_s23 + $0x40] sm:$0xff]  }
  0x18   : > { %v2022_v22 = vld [vmem:[%s2126_s23 + $0x54] sm:$0xff]   ;;  %v2023_v23 = vld [vmem:[%s2126_s23 + $0x48] sm:$0xff]   ;;  %v2024_v24 = vld [vmem:[%s2126_s23 + $0x5c] sm:$0xff]  }
  0x19   : > { %v2025_v25 = vld [vmem:[%s2126_s23 + $0x50] sm:$0xff]   ;;  %v2026_v26 = vld [vmem:[%s2126_s23 + $0x64] sm:$0xff]   ;;  %v2027_v27 = vld [vmem:[%s2126_s23 + $0x58] sm:$0xff]  }
  0x1a   : > { %v2028_v28 = vld [vmem:[%s2126_s23 + $0x6c] sm:$0xff]   ;;  %v2029_v29 = vld [vmem:[%s2126_s23 + $0x60] sm:$0xff]   ;;  %v2030_v30 = vld [vmem:[%s2126_s23 + $0x74] sm:$0xff]  }
  0x1b   : > { %v2031_v31 = vld [vmem:[%s2126_s23 + $0x68] sm:$0xff]   ;;  %v2032_v32 = vld [vmem:[%s2126_s23 + $0x7c] sm:$0xff]   ;;  %v2033_v33 = vld [vmem:[%s2126_s23 + $0x70] sm:$0xff]  }
  0x1c   : > { %1835 = vmatmul.mubr.msk.bf16.gmra.mrb[4].mxu1 %vm424_vm1, %v2010_v10  ;;  %1885 = vmatmul.mubr.msk.bf16.gmra.mrb[4].mxu0 %vm424_vm1, %v2011_v11  ;;  %v2034_v34 = vld [vmem:[%s2126_s23 + $0x84] sm:$0xff]   ;;  %v2035_v35 = vld [vmem:[%s2126_s23 + $0x78] sm:$0xff]   ;;  %v2036_v36 = vld [vmem:[%s2126_s23 + $0x8c] sm:$0xff]  }
  0x1d   : > { %1838 = vmatprep.mubr.msk.bf16.mxu1 %vm424_vm1, %v2012_v12  ;;  %1888 = vmatprep.mubr.msk.bf16.mxu0 %vm424_vm1, %v2013_v13  ;;  %v2037_v37 = vld [vmem:[%s2126_s23 + $0x80] sm:$0xff]   ;;  %v2038_v38 = vld [vmem:[%s2126_s23 + $0x94] sm:$0xff]   ;;  %v2039_v39 = vld [vmem:[%s2126_s23 + $0x88] sm:$0xff]  }
  0x1e   : > { %v2040_v40 = vld [vmem:[%s2126_s23 + $0x9c] sm:$0xff]   ;;  %v2041_v41 = vld [vmem:[%s2126_s23 + $0x90] sm:$0xff]   ;;  %v2042_v42 = vld [vmem:[%s2126_s23 + $0xa4] sm:$0xff]  }
  0x1f   : > { %v2043_v43 = vld [vmem:[%s2126_s23 + $0x98] sm:$0xff]   ;;  %v2044_v44 = vld [vmem:[%s2126_s23 + $0xac] sm:$0xff]   ;;  %v2045_v45 = vld [vmem:[%s2126_s23 + $0xa0] sm:$0xff]  }
  0x20   : > { %v2046_v46 = vld [vmem:[%s2126_s23 + $0xb4] sm:$0xff]   ;;  %v2047_v47 = vld [vmem:[%s2126_s23 + $0xa8] sm:$0xff]   ;;  %v2048_v48 = vld [vmem:[%s2126_s23 + $0xbc] sm:$0xff]  }
  0x21   : > { %v2049_v49 = vld [vmem:[%s2126_s23 + $0xb0] sm:$0xff]   ;;  %v2050_v50 = vld [vmem:[%s2126_s23 + $0xc4] sm:$0xff]   ;;  %v2051_v51 = vld [vmem:[%s2126_s23 + $0xb8] sm:$0xff]  }
  0x24   : > { %1839 = vmatmul.mubr.msk.bf16.gmra.mrb[8].mxu1 %vm424_vm1, %v2014_v14  ;;  %1889 = vmatmul.mubr.msk.bf16.gmra.mrb[8].mxu0 %vm424_vm1, %v2015_v15 }
  0x25   : > { %1842 = vmatprep.mubr.msk.bf16.mxu1 %vm424_vm1, %v2016_v16  ;;  %1892 = vmatprep.mubr.msk.bf16.mxu0 %vm424_vm1, %v2017_v17 }
  0x2c   : > { %1843 = vmatmul.mubr.msk.bf16.gmra.mrb[12].mxu1 %vm424_vm1, %v2018_v18  ;;  %1893 = vmatmul.mubr.msk.bf16.gmra.mrb[12].mxu0 %vm424_vm1, %v2019_v19 }
  0x2d   : > { %1846 = vmatprep.mubr.msk.bf16.mxu1 %vm424_vm1, %v2020_v20  ;;  %1896 = vmatprep.mubr.msk.bf16.mxu0 %vm424_vm1, %v2021_v21 }
  0x34   : > { %1847 = vmatmul.mubr.msk.bf16.gmra.mrb[16].mxu1 %vm424_vm1, %v2022_v22  ;;  %1897 = vmatmul.mubr.msk.bf16.gmra.mrb[16].mxu0 %vm424_vm1, %v2023_v23 }
  0x35   : > { %1850 = vmatprep.mubr.msk.bf16.mxu1 %vm424_vm1, %v2024_v24  ;;  %1900 = vmatprep.mubr.msk.bf16.mxu0 %vm424_vm1, %v2025_v25 }
  0x3c   : > { %1851 = vmatmul.mubr.msk.bf16.gmra.mrb[20].mxu1 %vm424_vm1, %v2026_v26  ;;  %1901 = vmatmul.mubr.msk.bf16.gmra.mrb[20].mxu0 %vm424_vm1, %v2027_v27 }
  0x3d   : > { %1854 = vmatprep.mubr.msk.bf16.mxu1 %vm424_vm1, %v2028_v28  ;;  %1904 = vmatprep.mubr.msk.bf16.mxu0 %vm424_vm1, %v2029_v29 }
  0x44   : > { %1855 = vmatmul.mubr.msk.bf16.gmra.mrb[24].mxu1 %vm424_vm1, %v2030_v30  ;;  %1905 = vmatmul.mubr.msk.bf16.gmra.mrb[24].mxu0 %vm424_vm1, %v2031_v31 }
  0x45   : > { %1858 = vmatprep.mubr.msk.bf16.mxu1 %vm424_vm1, %v2032_v32  ;;  %1908 = vmatprep.mubr.msk.bf16.mxu0 %vm424_vm1, %v2033_v33 }
  0x4c   : > { %1859 = vmatmul.mubr.msk.bf16.gmra.mrb[28].mxu1 %vm424_vm1, %v2034_v34  ;;  %1909 = vmatmul.mubr.msk.bf16.gmra.mrb[28].mxu0 %vm424_vm1, %v2035_v35 }
  0x4d   : > { %1862 = vmatprep.mubr.msk.bf16.mxu1 %vm424_vm1, %v2036_v36  ;;  %1912 = vmatprep.mubr.msk.bf16.mxu0 %vm424_vm1, %v2037_v37 }
  0x54   : > { %1863 = vmatmul.mubr.msk.bf16.gmra.mrb[32].mxu1 %vm424_vm1, %v2038_v38  ;;  %1913 = vmatmul.mubr.msk.bf16.gmra.mrb[32].mxu0 %vm424_vm1, %v2039_v39 }
  0x55   : > { %1866 = vmatprep.mubr.msk.bf16.mxu1 %vm424_vm1, %v2040_v40  ;;  %1916 = vmatprep.mubr.msk.bf16.mxu0 %vm424_vm1, %v2041_v41 }
  0x5c   : > { %1867 = vmatmul.mubr.msk.bf16.gmra.mrb[36].mxu1 %vm424_vm1, %v2042_v42  ;;  %1917 = vmatmul.mubr.msk.bf16.gmra.mrb[36].mxu0 %vm424_vm1, %v2043_v43 }
  0x5d   : > { %1870 = vmatprep.mubr.msk.bf16.mxu1 %vm424_vm1, %v2044_v44  ;;  %1920 = vmatprep.mubr.msk.bf16.mxu0 %vm424_vm1, %v2045_v45 }
  0x64   : > { %1871 = vmatmul.mubr.msk.bf16.gmra.mrb[40].mxu1 %vm424_vm1, %v2046_v46  ;;  %1921 = vmatmul.mubr.msk.bf16.gmra.mrb[40].mxu0 %vm424_vm1, %v2047_v47 }
  0x65   : > { %1874 = vmatprep.mubr.msk.bf16.mxu1 %vm424_vm1, %v2048_v48  ;;  %1924 = vmatprep.mubr.msk.bf16.mxu0 %vm424_vm1, %v2049_v49 }
  0x6c   : > { %1875 = vmatmul.mubr.msk.bf16.gmra.mrb[44].mxu1 %vm424_vm1, %v2050_v50  ;;  %1925 = vmatmul.mubr.msk.bf16.gmra.mrb[44].mxu0 %vm424_vm1, %v2051_v51 }
  0xe7   : > { %v1832_v52 = vpop.f32.mrb[0].mxu1  ;;  %v1882_v53 = vpop.f32.mrb[0].mxu0 }
  0xe8   : > { %v535_v55 = vpop.f32.mrb[1].mxu1  ;;  %v964_v56 = vadd.f32 %v1882_v53, %v1832_v52  ;;  %v955_v57 = vpop.f32.mrb[1].mxu0 }
  0xe9   : > { %v1833_v58 = vpop.f32.mrb[2].mxu1  ;;  %v956_v59 = vadd.f32 %v955_v57, %v535_v55  ;;  %v1883_v60 = vpop.f32.mrb[2].mxu0 }
  0xea   : > { %v538_v61 = vpop.f32.mrb[3].mxu1  ;;  %v1155_v62 = vadd.f32 %v2228_v54, %v964_v56  ;;  %v967_v63 = vadd.f32 %v1883_v60, %v1833_v58  ;;  %v958_v0 = vpop.f32.mrb[3].mxu0 }
  0xeb   : > { %v1153_v1 = vadd.f32 %v2228_v54, %v956_v59  ;;  %v959_v2 = vadd.f32 %v958_v0, %v538_v61 }
  0xec   : > { %v1732_v3 = vpack.c.bf16 %v1155_v62, %v1155_v62  ;;  %v1156_v4 = vadd.f32 %v2228_v54, %v967_v63 }
  0xed   : > { %v1730_v5 = vpack.c.bf16 %v1153_v1, %v1153_v1  ;;  %v1154_v6 = vadd.f32 %v2228_v54, %v959_v2 }
  0xee   : > { %1396 = vst.msk [vmem:[%s2234_s29 + $0x8] sm:$0xf] %vm1393_vm2, %v1732_v3  ;;  %v1733_v7 = vpack.c.bf16 %v1156_v4, %v1156_v4 }
  0xef   : > { %v1836_v8 = vpop.f32.mrb[4].mxu1  ;;  %1394 = vst.msk [vmem:[%s2234_s29] sm:$0xf] %vm1393_vm2, %v1730_v5  ;;  %v1731_v9 = vpack.c.bf16 %v1154_v6, %v1154_v6  ;;  %v1886_v10 = vpop.f32.mrb[4].mxu0 }
  0xf0   : > { %v551_v11 = vpop.f32.mrb[5].mxu1  ;;  %1397 = vst.msk [vmem:[%s2234_s29 + $0xc] sm:$0xf] %vm1393_vm2, %v1733_v7  ;;  %v980_v12 = vadd.f32 %v1886_v10, %v1836_v8  ;;  %v971_v13 = vpop.f32.mrb[5].mxu0 }
  0xf1   : > { %v1837_v14 = vpop.f32.mrb[6].mxu1  ;;  %1395 = vst.msk [vmem:[%s2234_s29 + $0x4] sm:$0xf] %vm1393_vm2, %v1731_v9  ;;  %v972_v15 = vadd.f32 %v971_v13, %v551_v11  ;;  %v1887_v16 = vpop.f32.mrb[6].mxu0 }
  0xf2   : > { %v554_v17 = vpop.f32.mrb[7].mxu1  ;;  %v1159_v18 = vadd.f32 %v2228_v54, %v980_v12  ;;  %v983_v19 = vadd.f32 %v1887_v16, %v1837_v14  ;;  %v974_v20 = vpop.f32.mrb[7].mxu0 }
  0xf3   : > { %v1157_v21 = vadd.f32 %v2228_v54, %v972_v15  ;;  %v975_v22 = vadd.f32 %v974_v20, %v554_v17 }
  0xf4   : > { %v1736_v23 = vpack.c.bf16 %v1159_v18, %v1159_v18  ;;  %v1160_v24 = vadd.f32 %v2228_v54, %v983_v19 }
  0xf5   : > { %v1734_v25 = vpack.c.bf16 %v1157_v21, %v1157_v21  ;;  %v1158_v26 = vadd.f32 %v2228_v54, %v975_v22 }
  0xf6   : > { %1400 = vst.msk [vmem:[%s2234_s29 + $0x18] sm:$0xf] %vm1393_vm2, %v1736_v23  ;;  %v1737_v27 = vpack.c.bf16 %v1160_v24, %v1160_v24 }
  0xf7   : > { %v1840_v28 = vpop.f32.mrb[8].mxu1  ;;  %1398 = vst.msk [vmem:[%s2234_s29 + $0x10] sm:$0xf] %vm1393_vm2, %v1734_v25  ;;  %v1735_v29 = vpack.c.bf16 %v1158_v26, %v1158_v26  ;;  %v1890_v30 = vpop.f32.mrb[8].mxu0 }
  0xf8   : > { %v567_v31 = vpop.f32.mrb[9].mxu1  ;;  %1401 = vst.msk [vmem:[%s2234_s29 + $0x1c] sm:$0xf] %vm1393_vm2, %v1737_v27  ;;  %v996_v32 = vadd.f32 %v1890_v30, %v1840_v28  ;;  %v987_v33 = vpop.f32.mrb[9].mxu0 }
  0xf9   : > { %v1841_v34 = vpop.f32.mrb[10].mxu1  ;;  %1399 = vst.msk [vmem:[%s2234_s29 + $0x14] sm:$0xf] %vm1393_vm2, %v1735_v29  ;;  %v988_v35 = vadd.f32 %v987_v33, %v567_v31  ;;  %v1891_v36 = vpop.f32.mrb[10].mxu0 }
  0xfa   : > { %v570_v37 = vpop.f32.mrb[11].mxu1  ;;  %v1163_v38 = vadd.f32 %v2228_v54, %v996_v32  ;;  %v999_v39 = vadd.f32 %v1891_v36, %v1841_v34  ;;  %v990_v40 = vpop.f32.mrb[11].mxu0 }
  0xfb   : > { %v1161_v41 = vadd.f32 %v2228_v54, %v988_v35  ;;  %v991_v42 = vadd.f32 %v990_v40, %v570_v37 }
  0xfc   : > { %v1740_v43 = vpack.c.bf16 %v1163_v38, %v1163_v38  ;;  %v1164_v44 = vadd.f32 %v2228_v54, %v999_v39 }
  0xfd   : > { %v1738_v45 = vpack.c.bf16 %v1161_v41, %v1161_v41  ;;  %v1162_v46 = vadd.f32 %v2228_v54, %v991_v42 }
  0xfe   : > { %1404 = vst.msk [vmem:[%s2234_s29 + $0x28] sm:$0xf] %vm1393_vm2, %v1740_v43  ;;  %v1741_v47 = vpack.c.bf16 %v1164_v44, %v1164_v44 }
  0xff   : > { %v1844_v48 = vpop.f32.mrb[12].mxu1  ;;  %1402 = vst.msk [vmem:[%s2234_s29 + $0x20] sm:$0xf] %vm1393_vm2, %v1738_v45  ;;  %v1739_v49 = vpack.c.bf16 %v1162_v46, %v1162_v46  ;;  %v1894_v50 = vpop.f32.mrb[12].mxu0 }
 0x100   : > { %v583_v51 = vpop.f32.mrb[13].mxu1  ;;  %1405 = vst.msk [vmem:[%s2234_s29 + $0x2c] sm:$0xf] %vm1393_vm2, %v1741_v47  ;;  %v1012_v52 = vadd.f32 %v1894_v50, %v1844_v48  ;;  %v1003_v53 = vpop.f32.mrb[13].mxu0 }
 0x101   : > { %v1845_v55 = vpop.f32.mrb[14].mxu1  ;;  %1403 = vst.msk [vmem:[%s2234_s29 + $0x24] sm:$0xf] %vm1393_vm2, %v1739_v49  ;;  %v1004_v56 = vadd.f32 %v1003_v53, %v583_v51  ;;  %v1895_v57 = vpop.f32.mrb[14].mxu0 }
 0x102   : > { %v586_v58 = vpop.f32.mrb[15].mxu1  ;;  %v1167_v59 = vadd.f32 %v2228_v54, %v1012_v52  ;;  %v1015_v60 = vadd.f32 %v1895_v57, %v1845_v55  ;;  %v1006_v61 = vpop.f32.mrb[15].mxu0 }
 0x103   : > { %v1165_v62 = vadd.f32 %v2228_v54, %v1004_v56  ;;  %v1007_v63 = vadd.f32 %v1006_v61, %v586_v58 }
 0x104   : > { %v1744_v0 = vpack.c.bf16 %v1167_v59, %v1167_v59  ;;  %v1168_v1 = vadd.f32 %v2228_v54, %v1015_v60 }
 0x105   : > { %v1742_v2 = vpack.c.bf16 %v1165_v62, %v1165_v62  ;;  %v1166_v3 = vadd.f32 %v2228_v54, %v1007_v63 }
 0x106   : > { %1408 = vst.msk [vmem:[%s2234_s29 + $0x38] sm:$0xf] %vm1393_vm2, %v1744_v0  ;;  %v1745_v4 = vpack.c.bf16 %v1168_v1, %v1168_v1 }
 0x107   : > { %v1848_v5 = vpop.f32.mrb[16].mxu1  ;;  %1406 = vst.msk [vmem:[%s2234_s29 + $0x30] sm:$0xf] %vm1393_vm2, %v1742_v2  ;;  %v1743_v6 = vpack.c.bf16 %v1166_v3, %v1166_v3  ;;  %v1898_v7 = vpop.f32.mrb[16].mxu0 }
 0x108   : > { %v599_v8 = vpop.f32.mrb[17].mxu1  ;;  %1409 = vst.msk [vmem:[%s2234_s29 + $0x3c] sm:$0xf] %vm1393_vm2, %v1745_v4  ;;  %v1028_v9 = vadd.f32 %v1898_v7, %v1848_v5  ;;  %v1019_v10 = vpop.f32.mrb[17].mxu0 }
 0x109   : > { %v1849_v11 = vpop.f32.mrb[18].mxu1  ;;  %1407 = vst.msk [vmem:[%s2234_s29 + $0x34] sm:$0xf] %vm1393_vm2, %v1743_v6  ;;  %v1020_v12 = vadd.f32 %v1019_v10, %v599_v8  ;;  %v1899_v13 = vpop.f32.mrb[18].mxu0 }
 0x10a   : > { %v602_v14 = vpop.f32.mrb[19].mxu1  ;;  %v1171_v15 = vadd.f32 %v2228_v54, %v1028_v9  ;;  %v1031_v16 = vadd.f32 %v1899_v13, %v1849_v11  ;;  %v1022_v17 = vpop.f32.mrb[19].mxu0 }
 0x10b   : > { %v1169_v18 = vadd.f32 %v2228_v54, %v1020_v12  ;;  %v1023_v19 = vadd.f32 %v1022_v17, %v602_v14 }
 0x10c   : > { %v1748_v20 = vpack.c.bf16 %v1171_v15, %v1171_v15  ;;  %v1172_v21 = vadd.f32 %v2228_v54, %v1031_v16 }
 0x10d   : > { %v1746_v22 = vpack.c.bf16 %v1169_v18, %v1169_v18  ;;  %v1170_v23 = vadd.f32 %v2228_v54, %v1023_v19 }
 0x10e   : > { %1412 = vst.msk [vmem:[%s2234_s29 + $0x48] sm:$0xf] %vm1393_vm2, %v1748_v20  ;;  %v1749_v24 = vpack.c.bf16 %v1172_v21, %v1172_v21 }
 0x10f   : > { %v1852_v25 = vpop.f32.mrb[20].mxu1  ;;  %1410 = vst.msk [vmem:[%s2234_s29 + $0x40] sm:$0xf] %vm1393_vm2, %v1746_v22  ;;  %v1747_v26 = vpack.c.bf16 %v1170_v23, %v1170_v23  ;;  %v1902_v27 = vpop.f32.mrb[20].mxu0 }
 0x110   : > { %v615_v28 = vpop.f32.mrb[21].mxu1  ;;  %1413 = vst.msk [vmem:[%s2234_s29 + $0x4c] sm:$0xf] %vm1393_vm2, %v1749_v24  ;;  %v1044_v29 = vadd.f32 %v1902_v27, %v1852_v25  ;;  %v1035_v30 = vpop.f32.mrb[21].mxu0 }
 0x111   : > { %v1853_v31 = vpop.f32.mrb[22].mxu1  ;;  %1411 = vst.msk [vmem:[%s2234_s29 + $0x44] sm:$0xf] %vm1393_vm2, %v1747_v26  ;;  %v1036_v32 = vadd.f32 %v1035_v30, %v615_v28  ;;  %v1903_v33 = vpop.f32.mrb[22].mxu0 }
 0x112   : > { %v618_v34 = vpop.f32.mrb[23].mxu1  ;;  %v1175_v35 = vadd.f32 %v2228_v54, %v1044_v29  ;;  %v1047_v36 = vadd.f32 %v1903_v33, %v1853_v31  ;;  %v1038_v37 = vpop.f32.mrb[23].mxu0 }
 0x113   : > { %v1173_v38 = vadd.f32 %v2228_v54, %v1036_v32  ;;  %v1039_v39 = vadd.f32 %v1038_v37, %v618_v34 }
 0x114   : > { %v1752_v40 = vpack.c.bf16 %v1175_v35, %v1175_v35  ;;  %v1176_v41 = vadd.f32 %v2228_v54, %v1047_v36 }
 0x115   : > { %v1750_v42 = vpack.c.bf16 %v1173_v38, %v1173_v38  ;;  %v1174_v43 = vadd.f32 %v2228_v54, %v1039_v39 }
 0x116   : > { %1416 = vst.msk [vmem:[%s2234_s29 + $0x58] sm:$0xf] %vm1393_vm2, %v1752_v40  ;;  %v1753_v44 = vpack.c.bf16 %v1176_v41, %v1176_v41 }
 0x117   : > { %v1856_v45 = vpop.f32.mrb[24].mxu1  ;;  %1414 = vst.msk [vmem:[%s2234_s29 + $0x50] sm:$0xf] %vm1393_vm2, %v1750_v42  ;;  %v1751_v46 = vpack.c.bf16 %v1174_v43, %v1174_v43  ;;  %v1906_v47 = vpop.f32.mrb[24].mxu0 }
 0x118   : > { %v631_v48 = vpop.f32.mrb[25].mxu1  ;;  %1417 = vst.msk [vmem:[%s2234_s29 + $0x5c] sm:$0xf] %vm1393_vm2, %v1753_v44  ;;  %v1060_v49 = vadd.f32 %v1906_v47, %v1856_v45  ;;  %v1051_v50 = vpop.f32.mrb[25].mxu0 }
 0x119   : > { %v1857_v51 = vpop.f32.mrb[26].mxu1  ;;  %1415 = vst.msk [vmem:[%s2234_s29 + $0x54] sm:$0xf] %vm1393_vm2, %v1751_v46  ;;  %v1052_v52 = vadd.f32 %v1051_v50, %v631_v48  ;;  %v1907_v53 = vpop.f32.mrb[26].mxu0 }
 0x11a   : > { %v634_v55 = vpop.f32.mrb[27].mxu1  ;;  %v1179_v56 = vadd.f32 %v2228_v54, %v1060_v49  ;;  %v1063_v57 = vadd.f32 %v1907_v53, %v1857_v51  ;;  %v1054_v58 = vpop.f32.mrb[27].mxu0 }
 0x11b   : > { %v1177_v59 = vadd.f32 %v2228_v54, %v1052_v52  ;;  %v1055_v60 = vadd.f32 %v1054_v58, %v634_v55 }
 0x11c   : > { %v1756_v61 = vpack.c.bf16 %v1179_v56, %v1179_v56  ;;  %v1180_v62 = vadd.f32 %v2228_v54, %v1063_v57 }
 0x11d   : > { %v1754_v63 = vpack.c.bf16 %v1177_v59, %v1177_v59  ;;  %v1178_v0 = vadd.f32 %v2228_v54, %v1055_v60 }
 0x11e   : > { %1420 = vst.msk [vmem:[%s2234_s29 + $0x68] sm:$0xf] %vm1393_vm2, %v1756_v61  ;;  %v1757_v1 = vpack.c.bf16 %v1180_v62, %v1180_v62 }
 0x11f   : > { %v1860_v2 = vpop.f32.mrb[28].mxu1  ;;  %1418 = vst.msk [vmem:[%s2234_s29 + $0x60] sm:$0xf] %vm1393_vm2, %v1754_v63  ;;  %v1755_v3 = vpack.c.bf16 %v1178_v0, %v1178_v0  ;;  %v1910_v4 = vpop.f32.mrb[28].mxu0 }
 0x120   : > { %v647_v5 = vpop.f32.mrb[29].mxu1  ;;  %1421 = vst.msk [vmem:[%s2234_s29 + $0x6c] sm:$0xf] %vm1393_vm2, %v1757_v1  ;;  %v1076_v6 = vadd.f32 %v1910_v4, %v1860_v2  ;;  %v1067_v7 = vpop.f32.mrb[29].mxu0 }
 0x121   : > { %v1861_v8 = vpop.f32.mrb[30].mxu1  ;;  %1419 = vst.msk [vmem:[%s2234_s29 + $0x64] sm:$0xf] %vm1393_vm2, %v1755_v3  ;;  %v1068_v9 = vadd.f32 %v1067_v7, %v647_v5  ;;  %v1911_v10 = vpop.f32.mrb[30].mxu0 }
 0x122   : > { %v650_v11 = vpop.f32.mrb[31].mxu1  ;;  %v1183_v12 = vadd.f32 %v2228_v54, %v1076_v6  ;;  %v1079_v13 = vadd.f32 %v1911_v10, %v1861_v8  ;;  %v1070_v14 = vpop.f32.mrb[31].mxu0 }
 0x123   : > { %v1181_v15 = vadd.f32 %v2228_v54, %v1068_v9  ;;  %v1071_v16 = vadd.f32 %v1070_v14, %v650_v11 }
 0x124   : > { %v1760_v17 = vpack.c.bf16 %v1183_v12, %v1183_v12  ;;  %v1184_v18 = vadd.f32 %v2228_v54, %v1079_v13 }
 0x125   : > { %v1758_v19 = vpack.c.bf16 %v1181_v15, %v1181_v15  ;;  %v1182_v20 = vadd.f32 %v2228_v54, %v1071_v16 }
 0x126   : > { %1424 = vst.msk [vmem:[%s2234_s29 + $0x78] sm:$0xf] %vm1393_vm2, %v1760_v17  ;;  %v1761_v21 = vpack.c.bf16 %v1184_v18, %v1184_v18 }
 0x127   : > { %v1864_v22 = vpop.f32.mrb[32].mxu1  ;;  %1422 = vst.msk [vmem:[%s2234_s29 + $0x70] sm:$0xf] %vm1393_vm2, %v1758_v19  ;;  %v1759_v23 = vpack.c.bf16 %v1182_v20, %v1182_v20  ;;  %v1914_v24 = vpop.f32.mrb[32].mxu0 }
 0x128   : > { %v663_v25 = vpop.f32.mrb[33].mxu1  ;;  %1425 = vst.msk [vmem:[%s2234_s29 + $0x7c] sm:$0xf] %vm1393_vm2, %v1761_v21  ;;  %v1092_v26 = vadd.f32 %v1914_v24, %v1864_v22  ;;  %v1083_v27 = vpop.f32.mrb[33].mxu0 }
 0x129   : > { %v1865_v28 = vpop.f32.mrb[34].mxu1  ;;  %1423 = vst.msk [vmem:[%s2234_s29 + $0x74] sm:$0xf] %vm1393_vm2, %v1759_v23  ;;  %v1084_v29 = vadd.f32 %v1083_v27, %v663_v25  ;;  %v1915_v30 = vpop.f32.mrb[34].mxu0 }
 0x12a   : > { %v666_v31 = vpop.f32.mrb[35].mxu1  ;;  %v1187_v32 = vadd.f32 %v2228_v54, %v1092_v26  ;;  %v1095_v33 = vadd.f32 %v1915_v30, %v1865_v28  ;;  %v1086_v34 = vpop.f32.mrb[35].mxu0 }
 0x12b   : > { %v1185_v35 = vadd.f32 %v2228_v54, %v1084_v29  ;;  %v1087_v36 = vadd.f32 %v1086_v34, %v666_v31 }
 0x12c   : > { %v1764_v37 = vpack.c.bf16 %v1187_v32, %v1187_v32  ;;  %v1188_v38 = vadd.f32 %v2228_v54, %v1095_v33 }
 0x12d   : > { %v1762_v39 = vpack.c.bf16 %v1185_v35, %v1185_v35  ;;  %v1186_v40 = vadd.f32 %v2228_v54, %v1087_v36 }
 0x12e   : > { %1428 = vst.msk [vmem:[%s2234_s29 + $0x88] sm:$0xf] %vm1393_vm2, %v1764_v37  ;;  %v1765_v41 = vpack.c.bf16 %v1188_v38, %v1188_v38 }
 0x12f   : > { %v1868_v42 = vpop.f32.mrb[36].mxu1  ;;  %1426 = vst.msk [vmem:[%s2234_s29 + $0x80] sm:$0xf] %vm1393_vm2, %v1762_v39  ;;  %v1763_v43 = vpack.c.bf16 %v1186_v40, %v1186_v40  ;;  %v1918_v44 = vpop.f32.mrb[36].mxu0 }
 0x130   : > { %v679_v45 = vpop.f32.mrb[37].mxu1  ;;  %1429 = vst.msk [vmem:[%s2234_s29 + $0x8c] sm:$0xf] %vm1393_vm2, %v1765_v41  ;;  %v1108_v46 = vadd.f32 %v1918_v44, %v1868_v42  ;;  %v1099_v47 = vpop.f32.mrb[37].mxu0 }
 0x131   : > { %v1869_v48 = vpop.f32.mrb[38].mxu1  ;;  %1427 = vst.msk [vmem:[%s2234_s29 + $0x84] sm:$0xf] %vm1393_vm2, %v1763_v43  ;;  %v1100_v49 = vadd.f32 %v1099_v47, %v679_v45  ;;  %v1919_v50 = vpop.f32.mrb[38].mxu0 }
 0x132   : > { %v682_v51 = vpop.f32.mrb[39].mxu1  ;;  %v1191_v52 = vadd.f32 %v2228_v54, %v1108_v46  ;;  %v1111_v53 = vadd.f32 %v1919_v50, %v1869_v48  ;;  %v1102_v55 = vpop.f32.mrb[39].mxu0 }
 0x133   : > { %v1189_v56 = vadd.f32 %v2228_v54, %v1100_v49  ;;  %v1103_v57 = vadd.f32 %v1102_v55, %v682_v51 }
 0x134   : > { %v1768_v58 = vpack.c.bf16 %v1191_v52, %v1191_v52  ;;  %v1192_v59 = vadd.f32 %v2228_v54, %v1111_v53 }
 0x135   : > { %v1766_v60 = vpack.c.bf16 %v1189_v56, %v1189_v56  ;;  %v1190_v61 = vadd.f32 %v2228_v54, %v1103_v57 }
 0x136   : > { %1432 = vst.msk [vmem:[%s2234_s29 + $0x98] sm:$0xf] %vm1393_vm2, %v1768_v58  ;;  %v1769_v62 = vpack.c.bf16 %v1192_v59, %v1192_v59 }
 0x137   : > { %v1872_v63 = vpop.f32.mrb[40].mxu1  ;;  %1430 = vst.msk [vmem:[%s2234_s29 + $0x90] sm:$0xf] %vm1393_vm2, %v1766_v60  ;;  %v1767_v0 = vpack.c.bf16 %v1190_v61, %v1190_v61  ;;  %v1922_v1 = vpop.f32.mrb[40].mxu0 }
 0x138   : > { %v695_v2 = vpop.f32.mrb[41].mxu1  ;;  %1433 = vst.msk [vmem:[%s2234_s29 + $0x9c] sm:$0xf] %vm1393_vm2, %v1769_v62  ;;  %v1124_v3 = vadd.f32 %v1922_v1, %v1872_v63  ;;  %v1115_v4 = vpop.f32.mrb[41].mxu0 }
 0x139   : > { %v1873_v5 = vpop.f32.mrb[42].mxu1  ;;  %1431 = vst.msk [vmem:[%s2234_s29 + $0x94] sm:$0xf] %vm1393_vm2, %v1767_v0  ;;  %v1116_v6 = vadd.f32 %v1115_v4, %v695_v2  ;;  %v1923_v7 = vpop.f32.mrb[42].mxu0 }
 0x13a   : > { %v698_v8 = vpop.f32.mrb[43].mxu1  ;;  %v1195_v9 = vadd.f32 %v2228_v54, %v1124_v3  ;;  %v1127_v10 = vadd.f32 %v1923_v7, %v1873_v5  ;;  %v1118_v11 = vpop.f32.mrb[43].mxu0 }
 0x13b   : > { %v1193_v12 = vadd.f32 %v2228_v54, %v1116_v6  ;;  %v1119_v13 = vadd.f32 %v1118_v11, %v698_v8 }
 0x13c   : > { %v1772_v14 = vpack.c.bf16 %v1195_v9, %v1195_v9  ;;  %v1196_v15 = vadd.f32 %v2228_v54, %v1127_v10 }
 0x13d   : > { %v1770_v16 = vpack.c.bf16 %v1193_v12, %v1193_v12  ;;  %v1194_v17 = vadd.f32 %v2228_v54, %v1119_v13 }
 0x13e   : > { %1436 = vst.msk [vmem:[%s2234_s29 + $0xa8] sm:$0xf] %vm1393_vm2, %v1772_v14  ;;  %v1773_v18 = vpack.c.bf16 %v1196_v15, %v1196_v15 }
 0x13f   : > { %v1876_v19 = vpop.f32.mrb[44].mxu1  ;;  %1434 = vst.msk [vmem:[%s2234_s29 + $0xa0] sm:$0xf] %vm1393_vm2, %v1770_v16  ;;  %v1771_v20 = vpack.c.bf16 %v1194_v17, %v1194_v17  ;;  %v1926_v21 = vpop.f32.mrb[44].mxu0 }
 0x140   : > { %v711_v22 = vpop.f32.mrb[45].mxu1  ;;  %1437 = vst.msk [vmem:[%s2234_s29 + $0xac] sm:$0xf] %vm1393_vm2, %v1773_v18  ;;  %v1140_v23 = vadd.f32 %v1926_v21, %v1876_v19  ;;  %v1131_v24 = vpop.f32.mrb[45].mxu0 }
 0x141   : > { %v1877_v25 = vpop.f32.mrb[46].mxu1  ;;  %1435 = vst.msk [vmem:[%s2234_s29 + $0xa4] sm:$0xf] %vm1393_vm2, %v1771_v20  ;;  %v1132_v26 = vadd.f32 %v1131_v24, %v711_v22  ;;  %v1927_v27 = vpop.f32.mrb[46].mxu0 }
 0x142   : > { %v714_v28 = vpop.f32.mrb[47].mxu1  ;;  %v1199_v29 = vadd.f32 %v2228_v54, %v1140_v23  ;;  %v1143_v30 = vadd.f32 %v1927_v27, %v1877_v25  ;;  %v1134_v31 = vpop.f32.mrb[47].mxu0 }
 0x143   : > { %v1197_v32 = vadd.f32 %v2228_v54, %v1132_v26  ;;  %v1135_v33 = vadd.f32 %v1134_v31, %v714_v28 }
 0x144   : > { %v1776_v34 = vpack.c.bf16 %v1199_v29, %v1199_v29  ;;  %v1200_v35 = vadd.f32 %v2228_v54, %v1143_v30 }
 0x145   : > { %v1774_v36 = vpack.c.bf16 %v1197_v32, %v1197_v32  ;;  %v1198_v37 = vadd.f32 %v2228_v54, %v1135_v33 }
 0x146   : > { %1440 = vst.msk [vmem:[%s2234_s29 + $0xb8] sm:$0xf] %vm1393_vm2, %v1776_v34  ;;  %v1777_v38 = vpack.c.bf16 %v1200_v35, %v1200_v35 }
 0x147   : > { %1438 = vst.msk [vmem:[%s2234_s29 + $0xb0] sm:$0xf] %vm1393_vm2, %v1774_v36  ;;  %v1775_v39 = vpack.c.bf16 %v1198_v37, %v1198_v37 }
 0x148   : > { %1441 = vst.msk [vmem:[%s2234_s29 + $0xbc] sm:$0xf] %vm1393_vm2, %v1777_v38 }
 0x149   : > { %1439 = vst.msk [vmem:[%s2234_s29 + $0xb4] sm:$0xf] %vm1393_vm2, %v1775_v39 }
 0x14a PF: > { %s13_s14 = sadd.s32 1, %s2074_s14   ;;  %s2392_s12 = smov %s2070_s13 }
 0x14b   : > { %p10_p5 = scmp.ge.s32.totalorder %s13_s14, 4   ;;  %s2393_s13 = smov %s2395_s15 }
 0x14d   :  { %12 = sbr.rel (!%p10_p5) target bundleno = 2 (0x2), region = 65 }

// kernel: tpu_custom_call.1
= control target key start
LH: loop header
LB: loop body
LE: loop exit
PB: predicated region body
PF: predicated region fallthrough
CT: control target
= control target key end

     0   :  { %s2096_s12 = smov 0   ;;  %s2098_s13 = smov 0   ;;  %s2388_s0 = inlined_call_operand.vmem [shape: bf16[2,408,8], index: 0, kind: input, shape index: {}]   ;;  %s2389_s1 = inlined_call_operand.vmem [shape: bf16[2,8,8], index: 1, kind: input, shape index: {}]   ;;  %s2390_s2 = inlined_call_operand.vmem [shape: f32[1,8], index: 2, kind: input, shape index: {}]   ;;  %s2391_s3 = inlined_call_operand.vmem [shape: bf16[2,384,8], index: 3, kind: output, shape index: {}]  }
   0x1   :  { %s2100_s14 = smov 0  }
   0x2 LB: > { %s25_s15 = sadd.s32 1, %s2070_s13  ;;  %p1531_p0 = scmp.ge.s32.totalorder %s2074_s14, 1  ;;  %s2074_s14 = sphi %s2100_s14, %s13_s14   ;;  %s2070_s13 = sphi %s2098_s13, %s2393_s13   ;;  %s2066_s12 = sphi %s2096_s12, %s2392_s12  }
   0x3   : > { %p27_p1 = scmp.ge.s32.totalorder %s25_s15, 2  ;;  %p151_p2 = scmp.lt.s32.totalorder %s2074_s14, 3 }
   0x5   : > { %s2395_s15 = smov (%p27_p1, %s25_s15), 0  ;;  %p152_p3 = pnand %p1531_p0, %p151_p2 }
   0x6   : > { %v1582_v0 = vld [vmem:[%s2389_s1 + $0x4] sm:$0xf] (!%p152_p3)  ;;  %vm497_vm0 = vcmask (!%p152_p3), 1043456   ;;  %v301_v1 = vld [vmem:[%s2389_s1] sm:$0xf] (!%p152_p3)  ;;  %p179_p4 = scmp.lt.s32.totalorder (!%p152_p3), %s2066_s12, 1 }
   0x7   : > { %155 = sbr.rel (%p152_p3) target bundleno = 330 (0x14a), region = 32  ;;  %1976 = vmatprep.subr.msk.bf16.mxu1 (!%p152_p3), %vm497_vm0, %v1582_v0  ;;  %1977 = vmatprep.subr.msk.bf16.mxu0 (!%p152_p3), %vm497_vm0, %v301_v1  ;;  %v499_v2 = vsel (!%p152_p3), %vm497_vm0, %v1582_v0, 0  ;;  %v919_v3 = vsel (!%p152_p3), %vm497_vm0, %v301_v1, 0  ;;  %vm424_vm1 = vcmask (!%p152_p3), 64512   ;;  %v2228_v54 = vld [vmem:[%s2390_s2] ss:$0 sm:$0xff] (!%p152_p3) }
   0x8   : > { %1829 = vmatpush3.bf16.msra.mxu1 (!%p152_p3), %v499_v2  ;;  %1879 = vmatpush3.bf16.msra.mxu0 (!%p152_p3), %v919_v3  ;;  %vm1393_vm2 = vcmask (!%p152_p3), 60416  }
   0xe   : > { %s2397_s12 = smov (!%p179_p4, %s2066_s12), 1 }
   0xf   : > { %s1978_s20 = smul.u32 204, %s2397_s12 }
  0x10   : > { %s1979_s24 = smul.u32 192, %s2397_s12 }
  0x11   : > { %s2126_s23 = scalar_lea.vmem %s2388_s0, %s1978_s20 }
  0x12   : > { %v2004_v4 = vld [vmem:[%s2126_s23 + $0xc] sm:$0xff]   ;;  %v2005_v5 = vld [vmem:[%s2126_s23] sm:$0xff]   ;;  %v2006_v6 = vld [vmem:[%s2126_s23 + $0x14] sm:$0xff]   ;;  %s2234_s29 = scalar_lea.vmem %s2391_s3, %s1979_s24 }
  0x13   : > { %1830 = vmatprep.mubr.msk.bf16.mxu1 %vm424_vm1, %v2004_v4  ;;  %1880 = vmatprep.mubr.msk.bf16.mxu0 %vm424_vm1, %v2005_v5  ;;  %v2007_v7 = vld [vmem:[%s2126_s23 + $0x8] sm:$0xff]   ;;  %v2008_v8 = vld [vmem:[%s2126_s23 + $0x1c] sm:$0xff]   ;;  %v2009_v9 = vld [vmem:[%s2126_s23 + $0x10] sm:$0xff]  }
  0x14   : > { %1831 = vmatmul.mubr.msk.bf16.vlgmr.msra.gmra.mrb[0].mxu1 %vm424_vm1, %v2006_v6  ;;  %1881 = vmatmul.mubr.msk.bf16.vlgmr.msra.gmra.mrb[0].mxu0 %vm424_vm1, %v2007_v7  ;;  %v2010_v10 = vld [vmem:[%s2126_s23 + $0x24] sm:$0xff]   ;;  %v2011_v11 = vld [vmem:[%s2126_s23 + $0x18] sm:$0xff]   ;;  %v2012_v12 = vld [vmem:[%s2126_s23 + $0x2c] sm:$0xff]  }
  0x15   : > { %1834 = vmatprep.mubr.msk.bf16.mxu1 %vm424_vm1, %v2008_v8  ;;  %1884 = vmatprep.mubr.msk.bf16.mxu0 %vm424_vm1, %v2009_v9  ;;  %v2013_v13 = vld [vmem:[%s2126_s23 + $0x20] sm:$0xff]   ;;  %v2014_v14 = vld [vmem:[%s2126_s23 + $0x34] sm:$0xff]   ;;  %v2015_v15 = vld [vmem:[%s2126_s23 + $0x28] sm:$0xff]  }
  0x16   : > { %v2016_v16 = vld [vmem:[%s2126_s23 + $0x3c] sm:$0xff]   ;;  %v2017_v17 = vld [vmem:[%s2126_s23 + $0x30] sm:$0xff]   ;;  %v2018_v18 = vld [vmem:[%s2126_s23 + $0x44] sm:$0xff]  }
  0x17   : > { %v2019_v19 = vld [vmem:[%s2126_s23 + $0x38] sm:$0xff]   ;;  %v2020_v20 = vld [vmem:[%s2126_s23 + $0x4c] sm:$0xff]   ;;  %v2021_v21 = vld [vmem:[%s2126_s23 + $0x40] sm:$0xff]  }
  0x18   : > { %v2022_v22 = vld [vmem:[%s2126_s23 + $0x54] sm:$0xff]   ;;  %v2023_v23 = vld [vmem:[%s2126_s23 + $0x48] sm:$0xff]   ;;  %v2024_v24 = vld [vmem:[%s2126_s23 + $0x5c] sm:$0xff]  }
  0x19   : > { %v2025_v25 = vld [vmem:[%s2126_s23 + $0x50] sm:$0xff]   ;;  %v2026_v26 = vld [vmem:[%s2126_s23 + $0x64] sm:$0xff]   ;;  %v2027_v27 = vld [vmem:[%s2126_s23 + $0x58] sm:$0xff]  }
  0x1a   : > { %v2028_v28 = vld [vmem:[%s2126_s23 + $0x6c] sm:$0xff]   ;;  %v2029_v29 = vld [vmem:[%s2126_s23 + $0x60] sm:$0xff]   ;;  %v2030_v30 = vld [vmem:[%s2126_s23 + $0x74] sm:$0xff]  }
  0x1b   : > { %v2031_v31 = vld [vmem:[%s2126_s23 + $0x68] sm:$0xff]   ;;  %v2032_v32 = vld [vmem:[%s2126_s23 + $0x7c] sm:$0xff]   ;;  %v2033_v33 = vld [vmem:[%s2126_s23 + $0x70] sm:$0xff]  }
  0x1c   : > { %1835 = vmatmul.mubr.msk.bf16.gmra.mrb[4].mxu1 %vm424_vm1, %v2010_v10  ;;  %1885 = vmatmul.mubr.msk.bf16.gmra.mrb[4].mxu0 %vm424_vm1, %v2011_v11  ;;  %v2034_v34 = vld [vmem:[%s2126_s23 + $0x84] sm:$0xff]   ;;  %v2035_v35 = vld [vmem:[%s2126_s23 + $0x78] sm:$0xff]   ;;  %v2036_v36 = vld [vmem:[%s2126_s23 + $0x8c] sm:$0xff]  }
  0x1d   : > { %1838 = vmatprep.mubr.msk.bf16.mxu1 %vm424_vm1, %v2012_v12  ;;  %1888 = vmatprep.mubr.msk.bf16.mxu0 %vm424_vm1, %v2013_v13  ;;  %v2037_v37 = vld [vmem:[%s2126_s23 + $0x80] sm:$0xff]   ;;  %v2038_v38 = vld [vmem:[%s2126_s23 + $0x94] sm:$0xff]   ;;  %v2039_v39 = vld [vmem:[%s2126_s23 + $0x88] sm:$0xff]  }
  0x1e   : > { %v2040_v40 = vld [vmem:[%s2126_s23 + $0x9c] sm:$0xff]   ;;  %v2041_v41 = vld [vmem:[%s2126_s23 + $0x90] sm:$0xff]   ;;  %v2042_v42 = vld [vmem:[%s2126_s23 + $0xa4] sm:$0xff]  }
  0x1f   : > { %v2043_v43 = vld [vmem:[%s2126_s23 + $0x98] sm:$0xff]   ;;  %v2044_v44 = vld [vmem:[%s2126_s23 + $0xac] sm:$0xff]   ;;  %v2045_v45 = vld [vmem:[%s2126_s23 + $0xa0] sm:$0xff]  }
  0x20   : > { %v2046_v46 = vld [vmem:[%s2126_s23 + $0xb4] sm:$0xff]   ;;  %v2047_v47 = vld [vmem:[%s2126_s23 + $0xa8] sm:$0xff]   ;;  %v2048_v48 = vld [vmem:[%s2126_s23 + $0xbc] sm:$0xff]  }
  0x21   : > { %v2049_v49 = vld [vmem:[%s2126_s23 + $0xb0] sm:$0xff]   ;;  %v2050_v50 = vld [vmem:[%s2126_s23 + $0xc4] sm:$0xff]   ;;  %v2051_v51 = vld [vmem:[%s2126_s23 + $0xb8] sm:$0xff]  }
  0x24   : > { %1839 = vmatmul.mubr.msk.bf16.gmra.mrb[8].mxu1 %vm424_vm1, %v2014_v14  ;;  %1889 = vmatmul.mubr.msk.bf16.gmra.mrb[8].mxu0 %vm424_vm1, %v2015_v15 }
  0x25   : > { %1842 = vmatprep.mubr.msk.bf16.mxu1 %vm424_vm1, %v2016_v16  ;;  %1892 = vmatprep.mubr.msk.bf16.mxu0 %vm424_vm1, %v2017_v17 }
  0x2c   : > { %1843 = vmatmul.mubr.msk.bf16.gmra.mrb[12].mxu1 %vm424_vm1, %v2018_v18  ;;  %1893 = vmatmul.mubr.msk.bf16.gmra.mrb[12].mxu0 %vm424_vm1, %v2019_v19 }
  0x2d   : > { %1846 = vmatprep.mubr.msk.bf16.mxu1 %vm424_vm1, %v2020_v20  ;;  %1896 = vmatprep.mubr.msk.bf16.mxu0 %vm424_vm1, %v2021_v21 }
  0x34   : > { %1847 = vmatmul.mubr.msk.bf16.gmra.mrb[16].mxu1 %vm424_vm1, %v2022_v22  ;;  %1897 = vmatmul.mubr.msk.bf16.gmra.mrb[16].mxu0 %vm424_vm1, %v2023_v23 }
  0x35   : > { %1850 = vmatprep.mubr.msk.bf16.mxu1 %vm424_vm1, %v2024_v24  ;;  %1900 = vmatprep.mubr.msk.bf16.mxu0 %vm424_vm1, %v2025_v25 }
  0x3c   : > { %1851 = vmatmul.mubr.msk.bf16.gmra.mrb[20].mxu1 %vm424_vm1, %v2026_v26  ;;  %1901 = vmatmul.mubr.msk.bf16.gmra.mrb[20].mxu0 %vm424_vm1, %v2027_v27 }
  0x3d   : > { %1854 = vmatprep.mubr.msk.bf16.mxu1 %vm424_vm1, %v2028_v28  ;;  %1904 = vmatprep.mubr.msk.bf16.mxu0 %vm424_vm1, %v2029_v29 }
  0x44   : > { %1855 = vmatmul.mubr.msk.bf16.gmra.mrb[24].mxu1 %vm424_vm1, %v2030_v30  ;;  %1905 = vmatmul.mubr.msk.bf16.gmra.mrb[24].mxu0 %vm424_vm1, %v2031_v31 }
  0x45   : > { %1858 = vmatprep.mubr.msk.bf16.mxu1 %vm424_vm1, %v2032_v32  ;;  %1908 = vmatprep.mubr.msk.bf16.mxu0 %vm424_vm1, %v2033_v33 }
  0x4c   : > { %1859 = vmatmul.mubr.msk.bf16.gmra.mrb[28].mxu1 %vm424_vm1, %v2034_v34  ;;  %1909 = vmatmul.mubr.msk.bf16.gmra.mrb[28].mxu0 %vm424_vm1, %v2035_v35 }
  0x4d   : > { %1862 = vmatprep.mubr.msk.bf16.mxu1 %vm424_vm1, %v2036_v36  ;;  %1912 = vmatprep.mubr.msk.bf16.mxu0 %vm424_vm1, %v2037_v37 }
  0x54   : > { %1863 = vmatmul.mubr.msk.bf16.gmra.mrb[32].mxu1 %vm424_vm1, %v2038_v38  ;;  %1913 = vmatmul.mubr.msk.bf16.gmra.mrb[32].mxu0 %vm424_vm1, %v2039_v39 }
  0x55   : > { %1866 = vmatprep.mubr.msk.bf16.mxu1 %vm424_vm1, %v2040_v40  ;;  %1916 = vmatprep.mubr.msk.bf16.mxu0 %vm424_vm1, %v2041_v41 }
  0x5c   : > { %1867 = vmatmul.mubr.msk.bf16.gmra.mrb[36].mxu1 %vm424_vm1, %v2042_v42  ;;  %1917 = vmatmul.mubr.msk.bf16.gmra.mrb[36].mxu0 %vm424_vm1, %v2043_v43 }
  0x5d   : > { %1870 = vmatprep.mubr.msk.bf16.mxu1 %vm424_vm1, %v2044_v44  ;;  %1920 = vmatprep.mubr.msk.bf16.mxu0 %vm424_vm1, %v2045_v45 }
  0x64   : > { %1871 = vmatmul.mubr.msk.bf16.gmra.mrb[40].mxu1 %vm424_vm1, %v2046_v46  ;;  %1921 = vmatmul.mubr.msk.bf16.gmra.mrb[40].mxu0 %vm424_vm1, %v2047_v47 }
  0x65   : > { %1874 = vmatprep.mubr.msk.bf16.mxu1 %vm424_vm1, %v2048_v48  ;;  %1924 = vmatprep.mubr.msk.bf16.mxu0 %vm424_vm1, %v2049_v49 }
  0x6c   : > { %1875 = vmatmul.mubr.msk.bf16.gmra.mrb[44].mxu1 %vm424_vm1, %v2050_v50  ;;  %1925 = vmatmul.mubr.msk.bf16.gmra.mrb[44].mxu0 %vm424_vm1, %v2051_v51 }
  0xe7   : > { %v1832_v52 = vpop.f32.mrb[0].mxu1  ;;  %v1882_v53 = vpop.f32.mrb[0].mxu0 }
  0xe8   : > { %v535_v55 = vpop.f32.mrb[1].mxu1  ;;  %v964_v56 = vadd.f32 %v1882_v53, %v1832_v52  ;;  %v955_v57 = vpop.f32.mrb[1].mxu0 }
  0xe9   : > { %v1833_v58 = vpop.f32.mrb[2].mxu1  ;;  %v956_v59 = vadd.f32 %v955_v57, %v535_v55  ;;  %v1883_v60 = vpop.f32.mrb[2].mxu0 }
  0xea   : > { %v538_v61 = vpop.f32.mrb[3].mxu1  ;;  %v1155_v62 = vadd.f32 %v2228_v54, %v964_v56  ;;  %v967_v63 = vadd.f32 %v1883_v60, %v1833_v58  ;;  %v958_v0 = vpop.f32.mrb[3].mxu0 }
  0xeb   : > { %v1153_v1 = vadd.f32 %v2228_v54, %v956_v59  ;;  %v959_v2 = vadd.f32 %v958_v0, %v538_v61 }
  0xec   : > { %v1732_v3 = vpack.c.bf16 %v1155_v62, %v1155_v62  ;;  %v1156_v4 = vadd.f32 %v2228_v54, %v967_v63 }
  0xed   : > { %v1730_v5 = vpack.c.bf16 %v1153_v1, %v1153_v1  ;;  %v1154_v6 = vadd.f32 %v2228_v54, %v959_v2 }
  0xee   : > { %1396 = vst.msk [vmem:[%s2234_s29 + $0x8] sm:$0xf] %vm1393_vm2, %v1732_v3  ;;  %v1733_v7 = vpack.c.bf16 %v1156_v4, %v1156_v4 }
  0xef   : > { %v1836_v8 = vpop.f32.mrb[4].mxu1  ;;  %1394 = vst.msk [vmem:[%s2234_s29] sm:$0xf] %vm1393_vm2, %v1730_v5  ;;  %v1731_v9 = vpack.c.bf16 %v1154_v6, %v1154_v6  ;;  %v1886_v10 = vpop.f32.mrb[4].mxu0 }
  0xf0   : > { %v551_v11 = vpop.f32.mrb[5].mxu1  ;;  %1397 = vst.msk [vmem:[%s2234_s29 + $0xc] sm:$0xf] %vm1393_vm2, %v1733_v7  ;;  %v980_v12 = vadd.f32 %v1886_v10, %v1836_v8  ;;  %v971_v13 = vpop.f32.mrb[5].mxu0 }
  0xf1   : > { %v1837_v14 = vpop.f32.mrb[6].mxu1  ;;  %1395 = vst.msk [vmem:[%s2234_s29 + $0x4] sm:$0xf] %vm1393_vm2, %v1731_v9  ;;  %v972_v15 = vadd.f32 %v971_v13, %v551_v11  ;;  %v1887_v16 = vpop.f32.mrb[6].mxu0 }
  0xf2   : > { %v554_v17 = vpop.f32.mrb[7].mxu1  ;;  %v1159_v18 = vadd.f32 %v2228_v54, %v980_v12  ;;  %v983_v19 = vadd.f32 %v1887_v16, %v1837_v14  ;;  %v974_v20 = vpop.f32.mrb[7].mxu0 }
  0xf3   : > { %v1157_v21 = vadd.f32 %v2228_v54, %v972_v15  ;;  %v975_v22 = vadd.f32 %v974_v20, %v554_v17 }
  0xf4   : > { %v1736_v23 = vpack.c.bf16 %v1159_v18, %v1159_v18  ;;  %v1160_v24 = vadd.f32 %v2228_v54, %v983_v19 }
  0xf5   : > { %v1734_v25 = vpack.c.bf16 %v1157_v21, %v1157_v21  ;;  %v1158_v26 = vadd.f32 %v2228_v54, %v975_v22 }
  0xf6   : > { %1400 = vst.msk [vmem:[%s2234_s29 + $0x18] sm:$0xf] %vm1393_vm2, %v1736_v23  ;;  %v1737_v27 = vpack.c.bf16 %v1160_v24, %v1160_v24 }
  0xf7   : > { %v1840_v28 = vpop.f32.mrb[8].mxu1  ;;  %1398 = vst.msk [vmem:[%s2234_s29 + $0x10] sm:$0xf] %vm1393_vm2, %v1734_v25  ;;  %v1735_v29 = vpack.c.bf16 %v1158_v26, %v1158_v26  ;;  %v1890_v30 = vpop.f32.mrb[8].mxu0 }
  0xf8   : > { %v567_v31 = vpop.f32.mrb[9].mxu1  ;;  %1401 = vst.msk [vmem:[%s2234_s29 + $0x1c] sm:$0xf] %vm1393_vm2, %v1737_v27  ;;  %v996_v32 = vadd.f32 %v1890_v30, %v1840_v28  ;;  %v987_v33 = vpop.f32.mrb[9].mxu0 }
  0xf9   : > { %v1841_v34 = vpop.f32.mrb[10].mxu1  ;;  %1399 = vst.msk [vmem:[%s2234_s29 + $0x14] sm:$0xf] %vm1393_vm2, %v1735_v29  ;;  %v988_v35 = vadd.f32 %v987_v33, %v567_v31  ;;  %v1891_v36 = vpop.f32.mrb[10].mxu0 }
  0xfa   : > { %v570_v37 = vpop.f32.mrb[11].mxu1  ;;  %v1163_v38 = vadd.f32 %v2228_v54, %v996_v32  ;;  %v999_v39 = vadd.f32 %v1891_v36, %v1841_v34  ;;  %v990_v40 = vpop.f32.mrb[11].mxu0 }
  0xfb   : > { %v1161_v41 = vadd.f32 %v2228_v54, %v988_v35  ;;  %v991_v42 = vadd.f32 %v990_v40, %v570_v37 }
  0xfc   : > { %v1740_v43 = vpack.c.bf16 %v1163_v38, %v1163_v38  ;;  %v1164_v44 = vadd.f32 %v2228_v54, %v999_v39 }
  0xfd   : > { %v1738_v45 = vpack.c.bf16 %v1161_v41, %v1161_v41  ;;  %v1162_v46 = vadd.f32 %v2228_v54, %v991_v42 }
  0xfe   : > { %1404 = vst.msk [vmem:[%s2234_s29 + $0x28] sm:$0xf] %vm1393_vm2, %v1740_v43  ;;  %v1741_v47 = vpack.c.bf16 %v1164_v44, %v1164_v44 }
  0xff   : > { %v1844_v48 = vpop.f32.mrb[12].mxu1  ;;  %1402 = vst.msk [vmem:[%s2234_s29 + $0x20] sm:$0xf] %vm1393_vm2, %v1738_v45  ;;  %v1739_v49 = vpack.c.bf16 %v1162_v46, %v1162_v46  ;;  %v1894_v50 = vpop.f32.mrb[12].mxu0 }
 0x100   : > { %v583_v51 = vpop.f32.mrb[13].mxu1  ;;  %1405 = vst.msk [vmem:[%s2234_s29 + $0x2c] sm:$0xf] %vm1393_vm2, %v1741_v47  ;;  %v1012_v52 = vadd.f32 %v1894_v50, %v1844_v48  ;;  %v1003_v53 = vpop.f32.mrb[13].mxu0 }
 0x101   : > { %v1845_v55 = vpop.f32.mrb[14].mxu1  ;;  %1403 = vst.msk [vmem:[%s2234_s29 + $0x24] sm:$0xf] %vm1393_vm2, %v1739_v49  ;;  %v1004_v56 = vadd.f32 %v1003_v53, %v583_v51  ;;  %v1895_v57 = vpop.f32.mrb[14].mxu0 }
 0x102   : > { %v586_v58 = vpop.f32.mrb[15].mxu1  ;;  %v1167_v59 = vadd.f32 %v2228_v54, %v1012_v52  ;;  %v1015_v60 = vadd.f32 %v1895_v57, %v1845_v55  ;;  %v1006_v61 = vpop.f32.mrb[15].mxu0 }
 0x103   : > { %v1165_v62 = vadd.f32 %v2228_v54, %v1004_v56  ;;  %v1007_v63 = vadd.f32 %v1006_v61, %v586_v58 }
 0x104   : > { %v1744_v0 = vpack.c.bf16 %v1167_v59, %v1167_v59  ;;  %v1168_v1 = vadd.f32 %v2228_v54, %v1015_v60 }
 0x105   : > { %v1742_v2 = vpack.c.bf16 %v1165_v62, %v1165_v62  ;;  %v1166_v3 = vadd.f32 %v2228_v54, %v1007_v63 }
 0x106   : > { %1408 = vst.msk [vmem:[%s2234_s29 + $0x38] sm:$0xf] %vm1393_vm2, %v1744_v0  ;;  %v1745_v4 = vpack.c.bf16 %v1168_v1, %v1168_v1 }
 0x107   : > { %v1848_v5 = vpop.f32.mrb[16].mxu1  ;;  %1406 = vst.msk [vmem:[%s2234_s29 + $0x30] sm:$0xf] %vm1393_vm2, %v1742_v2  ;;  %v1743_v6 = vpack.c.bf16 %v1166_v3, %v1166_v3  ;;  %v1898_v7 = vpop.f32.mrb[16].mxu0 }
 0x108   : > { %v599_v8 = vpop.f32.mrb[17].mxu1  ;;  %1409 = vst.msk [vmem:[%s2234_s29 + $0x3c] sm:$0xf] %vm1393_vm2, %v1745_v4  ;;  %v1028_v9 = vadd.f32 %v1898_v7, %v1848_v5  ;;  %v1019_v10 = vpop.f32.mrb[17].mxu0 }
 0x109   : > { %v1849_v11 = vpop.f32.mrb[18].mxu1  ;;  %1407 = vst.msk [vmem:[%s2234_s29 + $0x34] sm:$0xf] %vm1393_vm2, %v1743_v6  ;;  %v1020_v12 = vadd.f32 %v1019_v10, %v599_v8  ;;  %v1899_v13 = vpop.f32.mrb[18].mxu0 }
 0x10a   : > { %v602_v14 = vpop.f32.mrb[19].mxu1  ;;  %v1171_v15 = vadd.f32 %v2228_v54, %v1028_v9  ;;  %v1031_v16 = vadd.f32 %v1899_v13, %v1849_v11  ;;  %v1022_v17 = vpop.f32.mrb[19].mxu0 }
 0x10b   : > { %v1169_v18 = vadd.f32 %v2228_v54, %v1020_v12  ;;  %v1023_v19 = vadd.f32 %v1022_v17, %v602_v14 }
 0x10c   : > { %v1748_v20 = vpack.c.bf16 %v1171_v15, %v1171_v15  ;;  %v1172_v21 = vadd.f32 %v2228_v54, %v1031_v16 }
 0x10d   : > { %v1746_v22 = vpack.c.bf16 %v1169_v18, %v1169_v18  ;;  %v1170_v23 = vadd.f32 %v2228_v54, %v1023_v19 }
 0x10e   : > { %1412 = vst.msk [vmem:[%s2234_s29 + $0x48] sm:$0xf] %vm1393_vm2, %v1748_v20  ;;  %v1749_v24 = vpack.c.bf16 %v1172_v21, %v1172_v21 }
 0x10f   : > { %v1852_v25 = vpop.f32.mrb[20].mxu1  ;;  %1410 = vst.msk [vmem:[%s2234_s29 + $0x40] sm:$0xf] %vm1393_vm2, %v1746_v22  ;;  %v1747_v26 = vpack.c.bf16 %v1170_v23, %v1170_v23  ;;  %v1902_v27 = vpop.f32.mrb[20].mxu0 }
 0x110   : > { %v615_v28 = vpop.f32.mrb[21].mxu1  ;;  %1413 = vst.msk [vmem:[%s2234_s29 + $0x4c] sm:$0xf] %vm1393_vm2, %v1749_v24  ;;  %v1044_v29 = vadd.f32 %v1902_v27, %v1852_v25  ;;  %v1035_v30 = vpop.f32.mrb[21].mxu0 }
 0x111   : > { %v1853_v31 = vpop.f32.mrb[22].mxu1  ;;  %1411 = vst.msk [vmem:[%s2234_s29 + $0x44] sm:$0xf] %vm1393_vm2, %v1747_v26  ;;  %v1036_v32 = vadd.f32 %v1035_v30, %v615_v28  ;;  %v1903_v33 = vpop.f32.mrb[22].mxu0 }
 0x112   : > { %v618_v34 = vpop.f32.mrb[23].mxu1  ;;  %v1175_v35 = vadd.f32 %v2228_v54, %v1044_v29  ;;  %v1047_v36 = vadd.f32 %v1903_v33, %v1853_v31  ;;  %v1038_v37 = vpop.f32.mrb[23].mxu0 }
 0x113   : > { %v1173_v38 = vadd.f32 %v2228_v54, %v1036_v32  ;;  %v1039_v39 = vadd.f32 %v1038_v37, %v618_v34 }
 0x114   : > { %v1752_v40 = vpack.c.bf16 %v1175_v35, %v1175_v35  ;;  %v1176_v41 = vadd.f32 %v2228_v54, %v1047_v36 }
 0x115   : > { %v1750_v42 = vpack.c.bf16 %v1173_v38, %v1173_v38  ;;  %v1174_v43 = vadd.f32 %v2228_v54, %v1039_v39 }
 0x116   : > { %1416 = vst.msk [vmem:[%s2234_s29 + $0x58] sm:$0xf] %vm1393_vm2, %v1752_v40  ;;  %v1753_v44 = vpack.c.bf16 %v1176_v41, %v1176_v41 }
 0x117   : > { %v1856_v45 = vpop.f32.mrb[24].mxu1  ;;  %1414 = vst.msk [vmem:[%s2234_s29 + $0x50] sm:$0xf] %vm1393_vm2, %v1750_v42  ;;  %v1751_v46 = vpack.c.bf16 %v1174_v43, %v1174_v43  ;;  %v1906_v47 = vpop.f32.mrb[24].mxu0 }
 0x118   : > { %v631_v48 = vpop.f32.mrb[25].mxu1  ;;  %1417 = vst.msk [vmem:[%s2234_s29 + $0x5c] sm:$0xf] %vm1393_vm2, %v1753_v44  ;;  %v1060_v49 = vadd.f32 %v1906_v47, %v1856_v45  ;;  %v1051_v50 = vpop.f32.mrb[25].mxu0 }
 0x119   : > { %v1857_v51 = vpop.f32.mrb[26].mxu1  ;;  %1415 = vst.msk [vmem:[%s2234_s29 + $0x54] sm:$0xf] %vm1393_vm2, %v1751_v46  ;;  %v1052_v52 = vadd.f32 %v1051_v50, %v631_v48  ;;  %v1907_v53 = vpop.f32.mrb[26].mxu0 }
 0x11a   : > { %v634_v55 = vpop.f32.mrb[27].mxu1  ;;  %v1179_v56 = vadd.f32 %v2228_v54, %v1060_v49  ;;  %v1063_v57 = vadd.f32 %v1907_v53, %v1857_v51  ;;  %v1054_v58 = vpop.f32.mrb[27].mxu0 }
 0x11b   : > { %v1177_v59 = vadd.f32 %v2228_v54, %v1052_v52  ;;  %v1055_v60 = vadd.f32 %v1054_v58, %v634_v55 }
 0x11c   : > { %v1756_v61 = vpack.c.bf16 %v1179_v56, %v1179_v56  ;;  %v1180_v62 = vadd.f32 %v2228_v54, %v1063_v57 }
 0x11d   : > { %v1754_v63 = vpack.c.bf16 %v1177_v59, %v1177_v59  ;;  %v1178_v0 = vadd.f32 %v2228_v54, %v1055_v60 }
 0x11e   : > { %1420 = vst.msk [vmem:[%s2234_s29 + $0x68] sm:$0xf] %vm1393_vm2, %v1756_v61  ;;  %v1757_v1 = vpack.c.bf16 %v1180_v62, %v1180_v62 }
 0x11f   : > { %v1860_v2 = vpop.f32.mrb[28].mxu1  ;;  %1418 = vst.msk [vmem:[%s2234_s29 + $0x60] sm:$0xf] %vm1393_vm2, %v1754_v63  ;;  %v1755_v3 = vpack.c.bf16 %v1178_v0, %v1178_v0  ;;  %v1910_v4 = vpop.f32.mrb[28].mxu0 }
 0x120   : > { %v647_v5 = vpop.f32.mrb[29].mxu1  ;;  %1421 = vst.msk [vmem:[%s2234_s29 + $0x6c] sm:$0xf] %vm1393_vm2, %v1757_v1  ;;  %v1076_v6 = vadd.f32 %v1910_v4, %v1860_v2  ;;  %v1067_v7 = vpop.f32.mrb[29].mxu0 }
 0x121   : > { %v1861_v8 = vpop.f32.mrb[30].mxu1  ;;  %1419 = vst.msk [vmem:[%s2234_s29 + $0x64] sm:$0xf] %vm1393_vm2, %v1755_v3  ;;  %v1068_v9 = vadd.f32 %v1067_v7, %v647_v5  ;;  %v1911_v10 = vpop.f32.mrb[30].mxu0 }
 0x122   : > { %v650_v11 = vpop.f32.mrb[31].mxu1  ;;  %v1183_v12 = vadd.f32 %v2228_v54, %v1076_v6  ;;  %v1079_v13 = vadd.f32 %v1911_v10, %v1861_v8  ;;  %v1070_v14 = vpop.f32.mrb[31].mxu0 }
 0x123   : > { %v1181_v15 = vadd.f32 %v2228_v54, %v1068_v9  ;;  %v1071_v16 = vadd.f32 %v1070_v14, %v650_v11 }
 0x124   : > { %v1760_v17 = vpack.c.bf16 %v1183_v12, %v1183_v12  ;;  %v1184_v18 = vadd.f32 %v2228_v54, %v1079_v13 }
 0x125   : > { %v1758_v19 = vpack.c.bf16 %v1181_v15, %v1181_v15  ;;  %v1182_v20 = vadd.f32 %v2228_v54, %v1071_v16 }
 0x126   : > { %1424 = vst.msk [vmem:[%s2234_s29 + $0x78] sm:$0xf] %vm1393_vm2, %v1760_v17  ;;  %v1761_v21 = vpack.c.bf16 %v1184_v18, %v1184_v18 }
 0x127   : > { %v1864_v22 = vpop.f32.mrb[32].mxu1  ;;  %1422 = vst.msk [vmem:[%s2234_s29 + $0x70] sm:$0xf] %vm1393_vm2, %v1758_v19  ;;  %v1759_v23 = vpack.c.bf16 %v1182_v20, %v1182_v20  ;;  %v1914_v24 = vpop.f32.mrb[32].mxu0 }
 0x128   : > { %v663_v25 = vpop.f32.mrb[33].mxu1  ;;  %1425 = vst.msk [vmem:[%s2234_s29 + $0x7c] sm:$0xf] %vm1393_vm2, %v1761_v21  ;;  %v1092_v26 = vadd.f32 %v1914_v24, %v1864_v22  ;;  %v1083_v27 = vpop.f32.mrb[33].mxu0 }
 0x129   : > { %v1865_v28 = vpop.f32.mrb[34].mxu1  ;;  %1423 = vst.msk [vmem:[%s2234_s29 + $0x74] sm:$0xf] %vm1393_vm2, %v1759_v23  ;;  %v1084_v29 = vadd.f32 %v1083_v27, %v663_v25  ;;  %v1915_v30 = vpop.f32.mrb[34].mxu0 }
 0x12a   : > { %v666_v31 = vpop.f32.mrb[35].mxu1  ;;  %v1187_v32 = vadd.f32 %v2228_v54, %v1092_v26  ;;  %v1095_v33 = vadd.f32 %v1915_v30, %v1865_v28  ;;  %v1086_v34 = vpop.f32.mrb[35].mxu0 }
 0x12b   : > { %v1185_v35 = vadd.f32 %v2228_v54, %v1084_v29  ;;  %v1087_v36 = vadd.f32 %v1086_v34, %v666_v31 }
 0x12c   : > { %v1764_v37 = vpack.c.bf16 %v1187_v32, %v1187_v32  ;;  %v1188_v38 = vadd.f32 %v2228_v54, %v1095_v33 }
 0x12d   : > { %v1762_v39 = vpack.c.bf16 %v1185_v35, %v1185_v35  ;;  %v1186_v40 = vadd.f32 %v2228_v54, %v1087_v36 }
 0x12e   : > { %1428 = vst.msk [vmem:[%s2234_s29 + $0x88] sm:$0xf] %vm1393_vm2, %v1764_v37  ;;  %v1765_v41 = vpack.c.bf16 %v1188_v38, %v1188_v38 }
 0x12f   : > { %v1868_v42 = vpop.f32.mrb[36].mxu1  ;;  %1426 = vst.msk [vmem:[%s2234_s29 + $0x80] sm:$0xf] %vm1393_vm2, %v1762_v39  ;;  %v1763_v43 = vpack.c.bf16 %v1186_v40, %v1186_v40  ;;  %v1918_v44 = vpop.f32.mrb[36].mxu0 }
 0x130   : > { %v679_v45 = vpop.f32.mrb[37].mxu1  ;;  %1429 = vst.msk [vmem:[%s2234_s29 + $0x8c] sm:$0xf] %vm1393_vm2, %v1765_v41  ;;  %v1108_v46 = vadd.f32 %v1918_v44, %v1868_v42  ;;  %v1099_v47 = vpop.f32.mrb[37].mxu0 }
 0x131   : > { %v1869_v48 = vpop.f32.mrb[38].mxu1  ;;  %1427 = vst.msk [vmem:[%s2234_s29 + $0x84] sm:$0xf] %vm1393_vm2, %v1763_v43  ;;  %v1100_v49 = vadd.f32 %v1099_v47, %v679_v45  ;;  %v1919_v50 = vpop.f32.mrb[38].mxu0 }
 0x132   : > { %v682_v51 = vpop.f32.mrb[39].mxu1  ;;  %v1191_v52 = vadd.f32 %v2228_v54, %v1108_v46  ;;  %v1111_v53 = vadd.f32 %v1919_v50, %v1869_v48  ;;  %v1102_v55 = vpop.f32.mrb[39].mxu0 }
 0x133   : > { %v1189_v56 = vadd.f32 %v2228_v54, %v1100_v49  ;;  %v1103_v57 = vadd.f32 %v1102_v55, %v682_v51 }
 0x134   : > { %v1768_v58 = vpack.c.bf16 %v1191_v52, %v1191_v52  ;;  %v1192_v59 = vadd.f32 %v2228_v54, %v1111_v53 }
 0x135   : > { %v1766_v60 = vpack.c.bf16 %v1189_v56, %v1189_v56  ;;  %v1190_v61 = vadd.f32 %v2228_v54, %v1103_v57 }
 0x136   : > { %1432 = vst.msk [vmem:[%s2234_s29 + $0x98] sm:$0xf] %vm1393_vm2, %v1768_v58  ;;  %v1769_v62 = vpack.c.bf16 %v1192_v59, %v1192_v59 }
 0x137   : > { %v1872_v63 = vpop.f32.mrb[40].mxu1  ;;  %1430 = vst.msk [vmem:[%s2234_s29 + $0x90] sm:$0xf] %vm1393_vm2, %v1766_v60  ;;  %v1767_v0 = vpack.c.bf16 %v1190_v61, %v1190_v61  ;;  %v1922_v1 = vpop.f32.mrb[40].mxu0 }
 0x138   : > { %v695_v2 = vpop.f32.mrb[41].mxu1  ;;  %1433 = vst.msk [vmem:[%s2234_s29 + $0x9c] sm:$0xf] %vm1393_vm2, %v1769_v62  ;;  %v1124_v3 = vadd.f32 %v1922_v1, %v1872_v63  ;;  %v1115_v4 = vpop.f32.mrb[41].mxu0 }
 0x139   : > { %v1873_v5 = vpop.f32.mrb[42].mxu1  ;;  %1431 = vst.msk [vmem:[%s2234_s29 + $0x94] sm:$0xf] %vm1393_vm2, %v1767_v0  ;;  %v1116_v6 = vadd.f32 %v1115_v4, %v695_v2  ;;  %v1923_v7 = vpop.f32.mrb[42].mxu0 }
 0x13a   : > { %v698_v8 = vpop.f32.mrb[43].mxu1  ;;  %v1195_v9 = vadd.f32 %v2228_v54, %v1124_v3  ;;  %v1127_v10 = vadd.f32 %v1923_v7, %v1873_v5  ;;  %v1118_v11 = vpop.f32.mrb[43].mxu0 }
 0x13b   : > { %v1193_v12 = vadd.f32 %v2228_v54, %v1116_v6  ;;  %v1119_v13 = vadd.f32 %v1118_v11, %v698_v8 }
 0x13c   : > { %v1772_v14 = vpack.c.bf16 %v1195_v9, %v1195_v9  ;;  %v1196_v15 = vadd.f32 %v2228_v54, %v1127_v10 }
 0x13d   : > { %v1770_v16 = vpack.c.bf16 %v1193_v12, %v1193_v12  ;;  %v1194_v17 = vadd.f32 %v2228_v54, %v1119_v13 }
 0x13e   : > { %1436 = vst.msk [vmem:[%s2234_s29 + $0xa8] sm:$0xf] %vm1393_vm2, %v1772_v14  ;;  %v1773_v18 = vpack.c.bf16 %v1196_v15, %v1196_v15 }
 0x13f   : > { %v1876_v19 = vpop.f32.mrb[44].mxu1  ;;  %1434 = vst.msk [vmem:[%s2234_s29 + $0xa0] sm:$0xf] %vm1393_vm2, %v1770_v16  ;;  %v1771_v20 = vpack.c.bf16 %v1194_v17, %v1194_v17  ;;  %v1926_v21 = vpop.f32.mrb[44].mxu0 }
 0x140   : > { %v711_v22 = vpop.f32.mrb[45].mxu1  ;;  %1437 = vst.msk [vmem:[%s2234_s29 + $0xac] sm:$0xf] %vm1393_vm2, %v1773_v18  ;;  %v1140_v23 = vadd.f32 %v1926_v21, %v1876_v19  ;;  %v1131_v24 = vpop.f32.mrb[45].mxu0 }
 0x141   : > { %v1877_v25 = vpop.f32.mrb[46].mxu1  ;;  %1435 = vst.msk [vmem:[%s2234_s29 + $0xa4] sm:$0xf] %vm1393_vm2, %v1771_v20  ;;  %v1132_v26 = vadd.f32 %v1131_v24, %v711_v22  ;;  %v1927_v27 = vpop.f32.mrb[46].mxu0 }
 0x142   : > { %v714_v28 = vpop.f32.mrb[47].mxu1  ;;  %v1199_v29 = vadd.f32 %v2228_v54, %v1140_v23  ;;  %v1143_v30 = vadd.f32 %v1927_v27, %v1877_v25  ;;  %v1134_v31 = vpop.f32.mrb[47].mxu0 }
 0x143   : > { %v1197_v32 = vadd.f32 %v2228_v54, %v1132_v26  ;;  %v1135_v33 = vadd.f32 %v1134_v31, %v714_v28 }
 0x144   : > { %v1776_v34 = vpack.c.bf16 %v1199_v29, %v1199_v29  ;;  %v1200_v35 = vadd.f32 %v2228_v54, %v1143_v30 }
 0x145   : > { %v1774_v36 = vpack.c.bf16 %v1197_v32, %v1197_v32  ;;  %v1198_v37 = vadd.f32 %v2228_v54, %v1135_v33 }
 0x146   : > { %1440 = vst.msk [vmem:[%s2234_s29 + $0xb8] sm:$0xf] %vm1393_vm2, %v1776_v34  ;;  %v1777_v38 = vpack.c.bf16 %v1200_v35, %v1200_v35 }
 0x147   : > { %1438 = vst.msk [vmem:[%s2234_s29 + $0xb0] sm:$0xf] %vm1393_vm2, %v1774_v36  ;;  %v1775_v39 = vpack.c.bf16 %v1198_v37, %v1198_v37 }
 0x148   : > { %1441 = vst.msk [vmem:[%s2234_s29 + $0xbc] sm:$0xf] %vm1393_vm2, %v1777_v38 }
 0x149   : > { %1439 = vst.msk [vmem:[%s2234_s29 + $0xb4] sm:$0xf] %vm1393_vm2, %v1775_v39 }
 0x14a PF: > { %s13_s14 = sadd.s32 1, %s2074_s14   ;;  %s2392_s12 = smov %s2070_s13 }
 0x14b   : > { %p10_p5 = scmp.ge.s32.totalorder %s13_s14, 4   ;;  %s2393_s13 = smov %s2395_s15 }
 0x14d   :  { %12 = sbr.rel (!%p10_p5) target bundleno = 2 (0x2), region = 65 }

</bundles_post_ra>
